<compile_context>
chip_gen: v5e
topology: v5e:2x2
jax: 0.10.0
libtpu: 0.0.40
codegen_flags: <defaults>
</compile_context>

<pallas_src>
import functools

import jax
import jax.numpy as jnp
from jax.experimental import pallas as pl
from jax.experimental.pallas import tpu as pltpu

EPS = 1e-5  # nn.InstanceNorm2d default eps, affine=False, no running stats


def _convblock_kernel(x_ref, w_ref, o_ref, xpad_ref, *,
                      b_tile, cin, cout, h, w, pad, stride, kh, kw, oh, ow,
                      use_act):
    # x_ref:    (b_tile, cin, h, w)     f32   raw NCHW image block
    # w_ref:    (kh*kw, cout, cin)      bf16  per-tap weight matrices
    # o_ref:    (b_tile, cout, oh*ow)   f32   NCHW-contiguous output block
    # xpad_ref: (cin, hp*wp)            bf16  flat zero-padded image scratch
    hp = h + 2 * pad
    wp = w + 2 * pad
    hw = oh * ow
    # Shifted-window length: lane l = stride*(wp*r + c) of every tap window
    # holds that tap's contribution to output pixel (r, c).
    win = stride * wp * (oh - 1) + stride * (ow - 1) + 1
    row_win = stride * (ow - 1) + 1

    # Exact 0/1 selection matrix compacting every stride-th lane of a row
    # window (the lane-strided "gather" is done on the MXU, which is idle).
    rr = jax.lax.broadcasted_iota(jnp.int32, (row_win, ow), 0)
    cc = jax.lax.broadcasted_iota(jnp.int32, (row_win, ow), 1)
    sel = (rr == stride * cc).astype(jnp.float32)

    # Per-tap weight matrices: tiny, load once per grid step.
    w_taps = [w_ref[t] for t in range(kh * kw)]

    # Zero the padded scratch once per step: pad lanes must read as 0; the
    # interior is fully overwritten for every image below.
    xpad_ref[...] = jnp.zeros_like(xpad_ref)

    inv_hw = 1.0 / float(hw)

    def per_image(b, carry):
        # ---- fused "im2col": flat zero-padded bf16 image in VMEM ------------
        for hh in range(h):                       # static -> constant lane offsets
            dst = (pad + hh) * wp + pad
            xpad_ref[:, dst:dst + w] = x_ref[b, :, hh, :].astype(jnp.bfloat16)

        # ---- Conv2d: kh*kw shifted-window matmuls, f32 accumulation ---------
        acc = jnp.zeros((cout, win), dtype=jnp.float32)
        for i in range(kh):
            for j in range(kw):
                start = i * wp + j
                window = xpad_ref[:, start:start + win]          # (cin, win) bf16
                acc = acc + jnp.dot(w_taps[i * kw + j], window,
                                    preferred_element_type=jnp.float32)

        # ---- compact the stride-decimated valid lanes, row by row -----------
        for r in range(oh):                       # static -> constant lane offsets
            rwin = acc[:, stride * wp * r:stride * wp * r + row_win]
            o_ref[b, :, r * ow:(r + 1) * ow] = jnp.dot(
                rwin, sel, preferred_element_type=jnp.float32)

        # ---- InstanceNorm2d (affine=False, biased variance) + ReLU, f32 -----
        y = o_ref[b]                                             # (cout, hw)
        mean = jnp.sum(y, axis=1, keepdims=True) * inv_hw
        var = jnp.sum(y * y, axis=1, keepdims=True) * inv_hw - mean * mean
        var = jnp.maximum(var, 0.0)        # guard catastrophic cancellation
        y = (y - mean) * jax.lax.rsqrt(var + EPS)
        if use_act:
            y = jnp.maximum(y, 0.0)                              # ReLU
        o_ref[b] = y
        return carry

    if b_tile == 1:
        per_image(0, 0)
    else:
        jax.lax.fori_loop(0, b_tile, per_image, 0)


def _vmem_capacity_bytes():
    try:
        return int(pltpu.get_tpu_info().vmem_capacity_bytes)
    except Exception:
        return 64 * 1024 * 1024       # v7x-safe fallback (smallest VMEM)


def _plan_tiling(n, cin, cout, h, w, pad, stride, kh, kw, oh, ow):
    """Generation-aware batch-tile + VMEM-limit choice (includes in+out blocks,
    double buffering, the padded-image scratch and working values)."""
    hp, wp = h + 2 * pad, w + 2 * pad
    hw = oh * ow
    win = stride * wp * (oh - 1) + stride * (ow - 1) + 1

    def resident_bytes(bt):
        in_blk = bt * cin * h * w * 4 * 2          # f32 input, double-buffered
        out_blk = bt * cout * hw * 4 * 2           # f32 output, double-buffered
        scratch = cin * hp * wp * 2                # bf16 padded image (single)
        wts = kh * kw * cout * cin * 2 * 2
        work = cout * (win + 2 * hw) * 4           # acc + epilogue temporaries
        return in_blk + out_blk + scratch + wts + work

    cap = _vmem_capacity_bytes()
    budget = int(0.40 * cap)                       # leave compiler headroom
    b_tile = 1
    for bt in range(1, n + 1):
        if n % bt:
            continue
        if n >= 2 and n // bt < 2:                 # keep >= 2 steps (v7x megacore)
            continue
        if resident_bytes(bt) <= budget:
            b_tile = bt
    vmem_limit = int(min(0.85 * cap,
                         max(32 * 1024 * 1024, 2 * resident_bytes(b_tile))))
    return b_tile, vmem_limit


def conv_block_down(x_nchw, weight, bias=None, *, stride, padding, use_act=True):
    """x_nchw: (N, Cin, H, W) f32; weight: (Cout, Cin, KH, KW); bias: (Cout,).

    The bias is accepted for API parity but not used: InstanceNorm2d with
    affine=False subtracts the per-channel mean, so a constant per-channel
    bias cancels exactly.
    """
    del bias
    n, cin, h, w = x_nchw.shape
    cout, cin2, kh, kw = weight.shape
    assert cin2 == cin
    s, p = stride, padding
    oh = (h + 2 * p - kh) // s + 1
    ow = (w + 2 * p - kw) // s + 1
    hw = oh * ow
    hp, wp = h + 2 * p, w + 2 * p

    # Per-tap (Cout, Cin) weight matrices, bf16 for the MXU (f32 accumulation).
    w_taps = weight.transpose(2, 3, 0, 1).reshape(kh * kw, cout, cin)
    w_taps = w_taps.astype(jnp.bfloat16)

    b_tile, vmem_limit = _plan_tiling(n, cin, cout, h, w, p, s, kh, kw, oh, ow)
    grid = (n // b_tile,)

    kernel = functools.partial(
        _convblock_kernel, b_tile=b_tile, cin=cin, cout=cout, h=h, w=w,
        pad=p, stride=s, kh=kh, kw=kw, oh=oh, ow=ow, use_act=use_act)

    out = pl.pallas_call(
        kernel,
        out_shape=jax.ShapeDtypeStruct((n, cout, hw), jnp.float32),
        grid_spec=pltpu.PrefetchScalarGridSpec(
            num_scalar_prefetch=0,
            grid=grid,
            in_specs=[
                pl.BlockSpec((b_tile, cin, h, w), lambda i: (i, 0, 0, 0)),   # x
                pl.BlockSpec((kh * kw, cout, cin), lambda i: (0, 0, 0)),     # W
            ],
            out_specs=pl.BlockSpec((b_tile, cout, hw), lambda i: (i, 0, 0)),
            scratch_shapes=[pltpu.VMEM((cin, hp * wp), jnp.bfloat16)],
        ),
        compiler_params=pltpu.CompilerParams(
            dimension_semantics=("parallel",),
            vmem_limit_bytes=vmem_limit),
    )(x_nchw.astype(jnp.float32), w_taps)

    # Kernel output is already NCHW-contiguous: free reshape, no transpose.
    return out.reshape(n, cout, oh, ow)


def _reference(x, weight, bias, *, stride, padding):
    # Pure-JAX f32 reference (includes the conv bias on purpose: it must
    # cancel under InstanceNorm, which this check validates).
    y = jax.lax.conv_general_dilated(
        x, weight, window_strides=(stride, stride),
        padding=((padding, padding), (padding, padding)),
        dimension_numbers=("NCHW", "OIHW", "NCHW"))
    y = y + bias.reshape(1, -1, 1, 1)
    mean = jnp.mean(y, axis=(2, 3), keepdims=True)
    var = jnp.mean((y - mean) ** 2, axis=(2, 3), keepdims=True)
    y = (y - mean) / jnp.sqrt(var + EPS)
    return jnp.maximum(y, 0.0)


if __name__ == "__main__":
    # ConvBlockDown(in_channels=4, out_channels=8, kernel_size=3, stride=2, padding=1)
    N, Cin, H, W = 2, 4, 16, 16
    Cout, KH, KW = 8, 3, 3
    stride, padding = 2, 1

    key = jax.random.PRNGKey(0)
    kx, kw_, kb = jax.random.split(key, 3)
    x = jax.random.normal(kx, (N, Cin, H, W), dtype=jnp.float32)
    weight = jax.random.normal(kw_, (Cout, Cin, KH, KW), dtype=jnp.float32) * 0.1
    bias = jax.random.normal(kb, (Cout,), dtype=jnp.float32) * 0.1

    out = conv_block_down(x, weight, bias, stride=stride, padding=padding)
    out = jax.block_until_ready(out)

    ref = _reference(x, weight, bias, stride=stride, padding=padding)
    assert out.shape == ref.shape == (N, Cout, H // 2, W // 2)
    # bf16 MXU operands for the conv and default-precision f32 matmul for the
    # lane compaction -> loosened tolerance vs the f32 reference.
    assert jnp.allclose(out, ref, atol=4e-2, rtol=4e-2)

    print("KERNEL_OK")
</pallas_src>

<mosaic_0001>
module attributes {stable_mosaic.version = 11 : i64} {
  func.func @_convblock_kernel(%arg0: i32, %arg1: memref<1x4x16x16xf32, #tpu.memory_space<vmem>>, %arg2: memref<9x8x4xbf16, #tpu.memory_space<vmem>>, %arg3: memref<1x8x64xf32, #tpu.memory_space<vmem>>, %arg4: memref<4x324xbf16, #tpu.memory_space<vmem>>) attributes {dimension_semantics = [#tpu.dimension_semantics<parallel>], iteration_bounds = array<i64: 2>, scalar_prefetch = 0 : i64, scratch_operands = 1 : i64, tpu.core_type = #tpu.core_type<tc>, window_params = [{transform_indices = @transform_0, window_bounds = array<i64: 1, 4, 16, 16>}, {pipeline_mode = #tpu.pipeline_mode<synchronous>, transform_indices = @transform_1, window_bounds = array<i64: 9, 8, 4>}, {transform_indices = @transform_2, window_bounds = array<i64: 1, 8, 64>}]} {
    %0 = tpu.iota {dimensions = array<i32: 0>} : vector<15x8xi32>
    %1 = tpu.iota {dimensions = array<i32: 1>} : vector<15x8xi32>
    %c2_i32 = arith.constant 2 : i32
    %2 = vector.broadcast %c2_i32 : i32 to vector<15x8xi32>
    %3 = arith.muli %2, %1 : vector<15x8xi32>
    %4 = arith.cmpi eq, %0, %3 : vector<15x8xi32>
    %5 = arith.extui %4 : vector<15x8xi1> to vector<15x8xi32>
    %6 = arith.sitofp %5 : vector<15x8xi32> to vector<15x8xf32>
    %c0 = arith.constant 0 : index
    %c0_0 = arith.constant 0 : index
    %c0_1 = arith.constant 0 : index
    %7 = vector.load %arg2[%c0, %c0_0, %c0_1] : memref<9x8x4xbf16, #tpu.memory_space<vmem>>, vector<1x8x4xbf16>
    %8 = vector.shape_cast %7 : vector<1x8x4xbf16> to vector<8x4xbf16>
    %c1 = arith.constant 1 : index
    %c0_2 = arith.constant 0 : index
    %c0_3 = arith.constant 0 : index
    %9 = vector.load %arg2[%c1, %c0_2, %c0_3] : memref<9x8x4xbf16, #tpu.memory_space<vmem>>, vector<1x8x4xbf16>
    %10 = vector.shape_cast %9 : vector<1x8x4xbf16> to vector<8x4xbf16>
    %c2 = arith.constant 2 : index
    %c0_4 = arith.constant 0 : index
    %c0_5 = arith.constant 0 : index
    %11 = vector.load %arg2[%c2, %c0_4, %c0_5] : memref<9x8x4xbf16, #tpu.memory_space<vmem>>, vector<1x8x4xbf16>
    %12 = vector.shape_cast %11 : vector<1x8x4xbf16> to vector<8x4xbf16>
    %c3 = arith.constant 3 : index
    %c0_6 = arith.constant 0 : index
    %c0_7 = arith.constant 0 : index
    %13 = vector.load %arg2[%c3, %c0_6, %c0_7] : memref<9x8x4xbf16, #tpu.memory_space<vmem>>, vector<1x8x4xbf16>
    %14 = vector.shape_cast %13 : vector<1x8x4xbf16> to vector<8x4xbf16>
    %c4 = arith.constant 4 : index
    %c0_8 = arith.constant 0 : index
    %c0_9 = arith.constant 0 : index
    %15 = vector.load %arg2[%c4, %c0_8, %c0_9] : memref<9x8x4xbf16, #tpu.memory_space<vmem>>, vector<1x8x4xbf16>
    %16 = vector.shape_cast %15 : vector<1x8x4xbf16> to vector<8x4xbf16>
    %c5 = arith.constant 5 : index
    %c0_10 = arith.constant 0 : index
    %c0_11 = arith.constant 0 : index
    %17 = vector.load %arg2[%c5, %c0_10, %c0_11] : memref<9x8x4xbf16, #tpu.memory_space<vmem>>, vector<1x8x4xbf16>
    %18 = vector.shape_cast %17 : vector<1x8x4xbf16> to vector<8x4xbf16>
    %c6 = arith.constant 6 : index
    %c0_12 = arith.constant 0 : index
    %c0_13 = arith.constant 0 : index
    %19 = vector.load %arg2[%c6, %c0_12, %c0_13] : memref<9x8x4xbf16, #tpu.memory_space<vmem>>, vector<1x8x4xbf16>
    %20 = vector.shape_cast %19 : vector<1x8x4xbf16> to vector<8x4xbf16>
    %c7 = arith.constant 7 : index
    %c0_14 = arith.constant 0 : index
    %c0_15 = arith.constant 0 : index
    %21 = vector.load %arg2[%c7, %c0_14, %c0_15] : memref<9x8x4xbf16, #tpu.memory_space<vmem>>, vector<1x8x4xbf16>
    %22 = vector.shape_cast %21 : vector<1x8x4xbf16> to vector<8x4xbf16>
    %c8 = arith.constant 8 : index
    %c0_16 = arith.constant 0 : index
    %c0_17 = arith.constant 0 : index
    %23 = vector.load %arg2[%c8, %c0_16, %c0_17] : memref<9x8x4xbf16, #tpu.memory_space<vmem>>, vector<1x8x4xbf16>
    %24 = vector.shape_cast %23 : vector<1x8x4xbf16> to vector<8x4xbf16>
    %cst = arith.constant 0.000000e+00 : bf16
    %25 = vector.broadcast %cst : bf16 to vector<4x324xbf16>
    %c0_18 = arith.constant 0 : index
    %c0_19 = arith.constant 0 : index
    %26 = vector.load %arg4[%c0_18, %c0_19] : memref<4x324xbf16, #tpu.memory_space<vmem>>, vector<4x324xbf16>
    tpu.vector_store %arg4[%c0_18, %c0_19], %25 {strides = array<i32>} : memref<4x324xbf16, #tpu.memory_space<vmem>>, vector<4x324xbf16>,
    %c0_20 = arith.constant 0 : index
    %c0_21 = arith.constant 0 : index
    %c0_22 = arith.constant 0 : index
    %c0_23 = arith.constant 0 : index
    %27 = vector.load %arg1[%c0_20, %c0_21, %c0_22, %c0_23] : memref<1x4x16x16xf32, #tpu.memory_space<vmem>>, vector<1x4x1x16xf32>
    %28 = vector.shape_cast %27 : vector<1x4x1x16xf32> to vector<4x16xf32>
    %29 = arith.truncf %28 : vector<4x16xf32> to vector<4x16xbf16>
    %c0_24 = arith.constant 0 : index
    %c19 = arith.constant 19 : index
    %30 = vector.load %arg4[%c0_24, %c19] : memref<4x324xbf16, #tpu.memory_space<vmem>>, vector<4x16xbf16>
    tpu.vector_store %arg4[%c0_24, %c19], %29 {strides = array<i32>} : memref<4x324xbf16, #tpu.memory_space<vmem>>, vector<4x16xbf16>,
    %c0_25 = arith.constant 0 : index
    %c0_26 = arith.constant 0 : index
    %c1_27 = arith.constant 1 : index
    %c0_28 = arith.constant 0 : index
    %31 = vector.load %arg1[%c0_25, %c0_26, %c1_27, %c0_28] : memref<1x4x16x16xf32, #tpu.memory_space<vmem>>, vector<1x4x1x16xf32>
    %32 = vector.shape_cast %31 : vector<1x4x1x16xf32> to vector<4x16xf32>
    %33 = arith.truncf %32 : vector<4x16xf32> to vector<4x16xbf16>
    %c0_29 = arith.constant 0 : index
    %c37 = arith.constant 37 : index
    %34 = vector.load %arg4[%c0_29, %c37] : memref<4x324xbf16, #tpu.memory_space<vmem>>, vector<4x16xbf16>
    tpu.vector_store %arg4[%c0_29, %c37], %33 {strides = array<i32>} : memref<4x324xbf16, #tpu.memory_space<vmem>>, vector<4x16xbf16>,
    %c0_30 = arith.constant 0 : index
    %c0_31 = arith.constant 0 : index
    %c2_32 = arith.constant 2 : index
    %c0_33 = arith.constant 0 : index
    %35 = vector.load %arg1[%c0_30, %c0_31, %c2_32, %c0_33] : memref<1x4x16x16xf32, #tpu.memory_space<vmem>>, vector<1x4x1x16xf32>
    %36 = vector.shape_cast %35 : vector<1x4x1x16xf32> to vector<4x16xf32>
    %37 = arith.truncf %36 : vector<4x16xf32> to vector<4x16xbf16>
    %c0_34 = arith.constant 0 : index
    %c55 = arith.constant 55 : index
    %38 = vector.load %arg4[%c0_34, %c55] : memref<4x324xbf16, #tpu.memory_space<vmem>>, vector<4x16xbf16>
    tpu.vector_store %arg4[%c0_34, %c55], %37 {strides = array<i32>} : memref<4x324xbf16, #tpu.memory_space<vmem>>, vector<4x16xbf16>,
    %c0_35 = arith.constant 0 : index
    %c0_36 = arith.constant 0 : index
    %c3_37 = arith.constant 3 : index
    %c0_38 = arith.constant 0 : index
    %39 = vector.load %arg1[%c0_35, %c0_36, %c3_37, %c0_38] : memref<1x4x16x16xf32, #tpu.memory_space<vmem>>, vector<1x4x1x16xf32>
    %40 = vector.shape_cast %39 : vector<1x4x1x16xf32> to vector<4x16xf32>
    %41 = arith.truncf %40 : vector<4x16xf32> to vector<4x16xbf16>
    %c0_39 = arith.constant 0 : index
    %c73 = arith.constant 73 : index
    %42 = vector.load %arg4[%c0_39, %c73] : memref<4x324xbf16, #tpu.memory_space<vmem>>, vector<4x16xbf16>
    tpu.vector_store %arg4[%c0_39, %c73], %41 {strides = array<i32>} : memref<4x324xbf16, #tpu.memory_space<vmem>>, vector<4x16xbf16>,
    %c0_40 = arith.constant 0 : index
    %c0_41 = arith.constant 0 : index
    %c4_42 = arith.constant 4 : index
    %c0_43 = arith.constant 0 : index
    %43 = vector.load %arg1[%c0_40, %c0_41, %c4_42, %c0_43] : memref<1x4x16x16xf32, #tpu.memory_space<vmem>>, vector<1x4x1x16xf32>
    %44 = vector.shape_cast %43 : vector<1x4x1x16xf32> to vector<4x16xf32>
    %45 = arith.truncf %44 : vector<4x16xf32> to vector<4x16xbf16>
    %c0_44 = arith.constant 0 : index
    %c91 = arith.constant 91 : index
    %46 = vector.load %arg4[%c0_44, %c91] : memref<4x324xbf16, #tpu.memory_space<vmem>>, vector<4x16xbf16>
    tpu.vector_store %arg4[%c0_44, %c91], %45 {strides = array<i32>} : memref<4x324xbf16, #tpu.memory_space<vmem>>, vector<4x16xbf16>,
    %c0_45 = arith.constant 0 : index
    %c0_46 = arith.constant 0 : index
    %c5_47 = arith.constant 5 : index
    %c0_48 = arith.constant 0 : index
    %47 = vector.load %arg1[%c0_45, %c0_46, %c5_47, %c0_48] : memref<1x4x16x16xf32, #tpu.memory_space<vmem>>, vector<1x4x1x16xf32>
    %48 = vector.shape_cast %47 : vector<1x4x1x16xf32> to vector<4x16xf32>
    %49 = arith.truncf %48 : vector<4x16xf32> to vector<4x16xbf16>
    %c0_49 = arith.constant 0 : index
    %c109 = arith.constant 109 : index
    %50 = vector.load %arg4[%c0_49, %c109] : memref<4x324xbf16, #tpu.memory_space<vmem>>, vector<4x16xbf16>
    tpu.vector_store %arg4[%c0_49, %c109], %49 {strides = array<i32>} : memref<4x324xbf16, #tpu.memory_space<vmem>>, vector<4x16xbf16>,
    %c0_50 = arith.constant 0 : index
    %c0_51 = arith.constant 0 : index
    %c6_52 = arith.constant 6 : index
    %c0_53 = arith.constant 0 : index
    %51 = vector.load %arg1[%c0_50, %c0_51, %c6_52, %c0_53] : memref<1x4x16x16xf32, #tpu.memory_space<vmem>>, vector<1x4x1x16xf32>
    %52 = vector.shape_cast %51 : vector<1x4x1x16xf32> to vector<4x16xf32>
    %53 = arith.truncf %52 : vector<4x16xf32> to vector<4x16xbf16>
    %c0_54 = arith.constant 0 : index
    %c127 = arith.constant 127 : index
    %54 = vector.load %arg4[%c0_54, %c127] : memref<4x324xbf16, #tpu.memory_space<vmem>>, vector<4x16xbf16>
    tpu.vector_store %arg4[%c0_54, %c127], %53 {strides = array<i32>} : memref<4x324xbf16, #tpu.memory_space<vmem>>, vector<4x16xbf16>,
    %c0_55 = arith.constant 0 : index
    %c0_56 = arith.constant 0 : index
    %c7_57 = arith.constant 7 : index
    %c0_58 = arith.constant 0 : index
    %55 = vector.load %arg1[%c0_55, %c0_56, %c7_57, %c0_58] : memref<1x4x16x16xf32, #tpu.memory_space<vmem>>, vector<1x4x1x16xf32>
    %56 = vector.shape_cast %55 : vector<1x4x1x16xf32> to vector<4x16xf32>
    %57 = arith.truncf %56 : vector<4x16xf32> to vector<4x16xbf16>
    %c0_59 = arith.constant 0 : index
    %c145 = arith.constant 145 : index
    %58 = vector.load %arg4[%c0_59, %c145] : memref<4x324xbf16, #tpu.memory_space<vmem>>, vector<4x16xbf16>
    tpu.vector_store %arg4[%c0_59, %c145], %57 {strides = array<i32>} : memref<4x324xbf16, #tpu.memory_space<vmem>>, vector<4x16xbf16>,
    %c0_60 = arith.constant 0 : index
    %c0_61 = arith.constant 0 : index
    %c8_62 = arith.constant 8 : index
    %c0_63 = arith.constant 0 : index
    %59 = vector.load %arg1[%c0_60, %c0_61, %c8_62, %c0_63] : memref<1x4x16x16xf32, #tpu.memory_space<vmem>>, vector<1x4x1x16xf32>
    %60 = vector.shape_cast %59 : vector<1x4x1x16xf32> to vector<4x16xf32>
    %61 = arith.truncf %60 : vector<4x16xf32> to vector<4x16xbf16>
    %c0_64 = arith.constant 0 : index
    %c163 = arith.constant 163 : index
    %62 = vector.load %arg4[%c0_64, %c163] : memref<4x324xbf16, #tpu.memory_space<vmem>>, vector<4x16xbf16>
    tpu.vector_store %arg4[%c0_64, %c163], %61 {strides = array<i32>} : memref<4x324xbf16, #tpu.memory_space<vmem>>, vector<4x16xbf16>,
    %c0_65 = arith.constant 0 : index
    %c0_66 = arith.constant 0 : index
    %c9 = arith.constant 9 : index
    %c0_67 = arith.constant 0 : index
    %63 = vector.load %arg1[%c0_65, %c0_66, %c9, %c0_67] : memref<1x4x16x16xf32, #tpu.memory_space<vmem>>, vector<1x4x1x16xf32>
    %64 = vector.shape_cast %63 : vector<1x4x1x16xf32> to vector<4x16xf32>
    %65 = arith.truncf %64 : vector<4x16xf32> to vector<4x16xbf16>
    %c0_68 = arith.constant 0 : index
    %c181 = arith.constant 181 : index
    %66 = vector.load %arg4[%c0_68, %c181] : memref<4x324xbf16, #tpu.memory_space<vmem>>, vector<4x16xbf16>
    tpu.vector_store %arg4[%c0_68, %c181], %65 {strides = array<i32>} : memref<4x324xbf16, #tpu.memory_space<vmem>>, vector<4x16xbf16>,
    %c0_69 = arith.constant 0 : index
    %c0_70 = arith.constant 0 : index
    %c10 = arith.constant 10 : index
    %c0_71 = arith.constant 0 : index
    %67 = vector.load %arg1[%c0_69, %c0_70, %c10, %c0_71] : memref<1x4x16x16xf32, #tpu.memory_space<vmem>>, vector<1x4x1x16xf32>
    %68 = vector.shape_cast %67 : vector<1x4x1x16xf32> to vector<4x16xf32>
    %69 = arith.truncf %68 : vector<4x16xf32> to vector<4x16xbf16>
    %c0_72 = arith.constant 0 : index
    %c199 = arith.constant 199 : index
    %70 = vector.load %arg4[%c0_72, %c199] : memref<4x324xbf16, #tpu.memory_space<vmem>>, vector<4x16xbf16>
    tpu.vector_store %arg4[%c0_72, %c199], %69 {strides = array<i32>} : memref<4x324xbf16, #tpu.memory_space<vmem>>, vector<4x16xbf16>,
    %c0_73 = arith.constant 0 : index
    %c0_74 = arith.constant 0 : index
    %c11 = arith.constant 11 : index
    %c0_75 = arith.constant 0 : index
    %71 = vector.load %arg1[%c0_73, %c0_74, %c11, %c0_75] : memref<1x4x16x16xf32, #tpu.memory_space<vmem>>, vector<1x4x1x16xf32>
    %72 = vector.shape_cast %71 : vector<1x4x1x16xf32> to vector<4x16xf32>
    %73 = arith.truncf %72 : vector<4x16xf32> to vector<4x16xbf16>
    %c0_76 = arith.constant 0 : index
    %c217 = arith.constant 217 : index
    %74 = vector.load %arg4[%c0_76, %c217] : memref<4x324xbf16, #tpu.memory_space<vmem>>, vector<4x16xbf16>
    tpu.vector_store %arg4[%c0_76, %c217], %73 {strides = array<i32>} : memref<4x324xbf16, #tpu.memory_space<vmem>>, vector<4x16xbf16>,
    %c0_77 = arith.constant 0 : index
    %c0_78 = arith.constant 0 : index
    %c12 = arith.constant 12 : index
    %c0_79 = arith.constant 0 : index
    %75 = vector.load %arg1[%c0_77, %c0_78, %c12, %c0_79] : memref<1x4x16x16xf32, #tpu.memory_space<vmem>>, vector<1x4x1x16xf32>
    %76 = vector.shape_cast %75 : vector<1x4x1x16xf32> to vector<4x16xf32>
    %77 = arith.truncf %76 : vector<4x16xf32> to vector<4x16xbf16>
    %c0_80 = arith.constant 0 : index
    %c235 = arith.constant 235 : index
    %78 = vector.load %arg4[%c0_80, %c235] : memref<4x324xbf16, #tpu.memory_space<vmem>>, vector<4x16xbf16>
    tpu.vector_store %arg4[%c0_80, %c235], %77 {strides = array<i32>} : memref<4x324xbf16, #tpu.memory_space<vmem>>, vector<4x16xbf16>,
    %c0_81 = arith.constant 0 : index
    %c0_82 = arith.constant 0 : index
    %c13 = arith.constant 13 : index
    %c0_83 = arith.constant 0 : index
    %79 = vector.load %arg1[%c0_81, %c0_82, %c13, %c0_83] : memref<1x4x16x16xf32, #tpu.memory_space<vmem>>, vector<1x4x1x16xf32>
    %80 = vector.shape_cast %79 : vector<1x4x1x16xf32> to vector<4x16xf32>
    %81 = arith.truncf %80 : vector<4x16xf32> to vector<4x16xbf16>
    %c0_84 = arith.constant 0 : index
    %c253 = arith.constant 253 : index
    %82 = vector.load %arg4[%c0_84, %c253] : memref<4x324xbf16, #tpu.memory_space<vmem>>, vector<4x16xbf16>
    tpu.vector_store %arg4[%c0_84, %c253], %81 {strides = array<i32>} : memref<4x324xbf16, #tpu.memory_space<vmem>>, vector<4x16xbf16>,
    %c0_85 = arith.constant 0 : index
    %c0_86 = arith.constant 0 : index
    %c14 = arith.constant 14 : index
    %c0_87 = arith.constant 0 : index
    %83 = vector.load %arg1[%c0_85, %c0_86, %c14, %c0_87] : memref<1x4x16x16xf32, #tpu.memory_space<vmem>>, vector<1x4x1x16xf32>
    %84 = vector.shape_cast %83 : vector<1x4x1x16xf32> to vector<4x16xf32>
    %85 = arith.truncf %84 : vector<4x16xf32> to vector<4x16xbf16>
    %c0_88 = arith.constant 0 : index
    %c271 = arith.constant 271 : index
    %86 = vector.load %arg4[%c0_88, %c271] : memref<4x324xbf16, #tpu.memory_space<vmem>>, vector<4x16xbf16>
    tpu.vector_store %arg4[%c0_88, %c271], %85 {strides = array<i32>} : memref<4x324xbf16, #tpu.memory_space<vmem>>, vector<4x16xbf16>,
    %c0_89 = arith.constant 0 : index
    %c0_90 = arith.constant 0 : index
    %c15 = arith.constant 15 : index
    %c0_91 = arith.constant 0 : index
    %87 = vector.load %arg1[%c0_89, %c0_90, %c15, %c0_91] : memref<1x4x16x16xf32, #tpu.memory_space<vmem>>, vector<1x4x1x16xf32>
    %88 = vector.shape_cast %87 : vector<1x4x1x16xf32> to vector<4x16xf32>
    %89 = arith.truncf %88 : vector<4x16xf32> to vector<4x16xbf16>
    %c0_92 = arith.constant 0 : index
    %c289 = arith.constant 289 : index
    %90 = vector.load %arg4[%c0_92, %c289] : memref<4x324xbf16, #tpu.memory_space<vmem>>, vector<4x16xbf16>
    tpu.vector_store %arg4[%c0_92, %c289], %89 {strides = array<i32>} : memref<4x324xbf16, #tpu.memory_space<vmem>>, vector<4x16xbf16>,
    %cst_93 = arith.constant 0.000000e+00 : f32
    %91 = vector.broadcast %cst_93 : f32 to vector<8x267xf32>
    %c0_94 = arith.constant 0 : index
    %c0_95 = arith.constant 0 : index
    %92 = vector.load %arg4[%c0_94, %c0_95] : memref<4x324xbf16, #tpu.memory_space<vmem>>, vector<4x267xbf16>
    %cst_96 = arith.constant dense<0.000000e+00> : vector<8x267xf32>
    %93 = tpu.matmul %8, %92, %cst_96 {dimension_numbers = #tpu.dot_dimension_numbers<[1], [0], [0], [1], [0, 0, 1, 1], [], []>} : vector<8x4xbf16>, vector<4x267xbf16>, vector<8x267xf32> -> vector<8x267xf32>
    %94 = arith.addf %91, %93 : vector<8x267xf32>
    %c0_97 = arith.constant 0 : index
    %c1_98 = arith.constant 1 : index
    %95 = vector.load %arg4[%c0_97, %c1_98] : memref<4x324xbf16, #tpu.memory_space<vmem>>, vector<4x267xbf16>
    %cst_99 = arith.constant dense<0.000000e+00> : vector<8x267xf32>
    %96 = tpu.matmul %10, %95, %cst_99 {dimension_numbers = #tpu.dot_dimension_numbers<[1], [0], [0], [1], [0, 0, 1, 1], [], []>} : vector<8x4xbf16>, vector<4x267xbf16>, vector<8x267xf32> -> vector<8x267xf32>
    %97 = arith.addf %94, %96 : vector<8x267xf32>
    %c0_100 = arith.constant 0 : index
    %c2_101 = arith.constant 2 : index
    %98 = vector.load %arg4[%c0_100, %c2_101] : memref<4x324xbf16, #tpu.memory_space<vmem>>, vector<4x267xbf16>
    %cst_102 = arith.constant dense<0.000000e+00> : vector<8x267xf32>
    %99 = tpu.matmul %12, %98, %cst_102 {dimension_numbers = #tpu.dot_dimension_numbers<[1], [0], [0], [1], [0, 0, 1, 1], [], []>} : vector<8x4xbf16>, vector<4x267xbf16>, vector<8x267xf32> -> vector<8x267xf32>
    %100 = arith.addf %97, %99 : vector<8x267xf32>
    %c0_103 = arith.constant 0 : index
    %c18 = arith.constant 18 : index
    %101 = vector.load %arg4[%c0_103, %c18] : memref<4x324xbf16, #tpu.memory_space<vmem>>, vector<4x267xbf16>
    %cst_104 = arith.constant dense<0.000000e+00> : vector<8x267xf32>
    %102 = tpu.matmul %14, %101, %cst_104 {dimension_numbers = #tpu.dot_dimension_numbers<[1], [0], [0], [1], [0, 0, 1, 1], [], []>} : vector<8x4xbf16>, vector<4x267xbf16>, vector<8x267xf32> -> vector<8x267xf32>
    %103 = arith.addf %100, %102 : vector<8x267xf32>
    %c0_105 = arith.constant 0 : index
    %c19_106 = arith.constant 19 : index
    %104 = vector.load %arg4[%c0_105, %c19_106] : memref<4x324xbf16, #tpu.memory_space<vmem>>, vector<4x267xbf16>
    %cst_107 = arith.constant dense<0.000000e+00> : vector<8x267xf32>
    %105 = tpu.matmul %16, %104, %cst_107 {dimension_numbers = #tpu.dot_dimension_numbers<[1], [0], [0], [1], [0, 0, 1, 1], [], []>} : vector<8x4xbf16>, vector<4x267xbf16>, vector<8x267xf32> -> vector<8x267xf32>
    %106 = arith.addf %103, %105 : vector<8x267xf32>
    %c0_108 = arith.constant 0 : index
    %c20 = arith.constant 20 : index
    %107 = vector.load %arg4[%c0_108, %c20] : memref<4x324xbf16, #tpu.memory_space<vmem>>, vector<4x267xbf16>
    %cst_109 = arith.constant dense<0.000000e+00> : vector<8x267xf32>
    %108 = tpu.matmul %18, %107, %cst_109 {dimension_numbers = #tpu.dot_dimension_numbers<[1], [0], [0], [1], [0, 0, 1, 1], [], []>} : vector<8x4xbf16>, vector<4x267xbf16>, vector<8x267xf32> -> vector<8x267xf32>
    %109 = arith.addf %106, %108 : vector<8x267xf32>
    %c0_110 = arith.constant 0 : index
    %c36 = arith.constant 36 : index
    %110 = vector.load %arg4[%c0_110, %c36] : memref<4x324xbf16, #tpu.memory_space<vmem>>, vector<4x267xbf16>
    %cst_111 = arith.constant dense<0.000000e+00> : vector<8x267xf32>
    %111 = tpu.matmul %20, %110, %cst_111 {dimension_numbers = #tpu.dot_dimension_numbers<[1], [0], [0], [1], [0, 0, 1, 1], [], []>} : vector<8x4xbf16>, vector<4x267xbf16>, vector<8x267xf32> -> vector<8x267xf32>
    %112 = arith.addf %109, %111 : vector<8x267xf32>
    %c0_112 = arith.constant 0 : index
    %c37_113 = arith.constant 37 : index
    %113 = vector.load %arg4[%c0_112, %c37_113] : memref<4x324xbf16, #tpu.memory_space<vmem>>, vector<4x267xbf16>
    %cst_114 = arith.constant dense<0.000000e+00> : vector<8x267xf32>
    %114 = tpu.matmul %22, %113, %cst_114 {dimension_numbers = #tpu.dot_dimension_numbers<[1], [0], [0], [1], [0, 0, 1, 1], [], []>} : vector<8x4xbf16>, vector<4x267xbf16>, vector<8x267xf32> -> vector<8x267xf32>
    %115 = arith.addf %112, %114 : vector<8x267xf32>
    %c0_115 = arith.constant 0 : index
    %c38 = arith.constant 38 : index
    %116 = vector.load %arg4[%c0_115, %c38] : memref<4x324xbf16, #tpu.memory_space<vmem>>, vector<4x267xbf16>
    %cst_116 = arith.constant dense<0.000000e+00> : vector<8x267xf32>
    %117 = tpu.matmul %24, %116, %cst_116 {dimension_numbers = #tpu.dot_dimension_numbers<[1], [0], [0], [1], [0, 0, 1, 1], [], []>} : vector<8x4xbf16>, vector<4x267xbf16>, vector<8x267xf32> -> vector<8x267xf32>
    %118 = arith.addf %115, %117 : vector<8x267xf32>
    %119 = vector.extract_strided_slice %118 {offsets = [0, 0], sizes = [8, 15], strides = [1, 1]} : vector<8x267xf32> to vector<8x15xf32>
    %cst_117 = arith.constant dense<0.000000e+00> : vector<8x8xf32>
    %120 = tpu.matmul %119, %6, %cst_117 {dimension_numbers = #tpu.dot_dimension_numbers<[1], [0], [0], [1], [0, 0, 1, 1], [], []>} : vector<8x15xf32>, vector<15x8xf32>, vector<8x8xf32> -> vector<8x8xf32>
    %c0_118 = arith.constant 0 : index
    %c0_119 = arith.constant 0 : index
    %c0_120 = arith.constant 0 : index
    %121 = vector.load %arg3[%c0_118, %c0_119, %c0_120] : memref<1x8x64xf32, #tpu.memory_space<vmem>>, vector<1x8x8xf32>
    %122 = vector.shape_cast %121 : vector<1x8x8xf32> to vector<8x8xf32>
    %123 = vector.shape_cast %120 : vector<8x8xf32> to vector<1x8x8xf32>
    tpu.vector_store %arg3[%c0_118, %c0_119, %c0_120], %123 {strides = array<i32>} : memref<1x8x64xf32, #tpu.memory_space<vmem>>, vector<1x8x8xf32>,
    %124 = vector.extract_strided_slice %118 {offsets = [0, 36], sizes = [8, 15], strides = [1, 1]} : vector<8x267xf32> to vector<8x15xf32>
    %cst_121 = arith.constant dense<0.000000e+00> : vector<8x8xf32>
    %125 = tpu.matmul %124, %6, %cst_121 {dimension_numbers = #tpu.dot_dimension_numbers<[1], [0], [0], [1], [0, 0, 1, 1], [], []>} : vector<8x15xf32>, vector<15x8xf32>, vector<8x8xf32> -> vector<8x8xf32>
    %c0_122 = arith.constant 0 : index
    %c0_123 = arith.constant 0 : index
    %c8_124 = arith.constant 8 : index
    %126 = vector.load %arg3[%c0_122, %c0_123, %c8_124] : memref<1x8x64xf32, #tpu.memory_space<vmem>>, vector<1x8x8xf32>
    %127 = vector.shape_cast %126 : vector<1x8x8xf32> to vector<8x8xf32>
    %128 = vector.shape_cast %125 : vector<8x8xf32> to vector<1x8x8xf32>
    tpu.vector_store %arg3[%c0_122, %c0_123, %c8_124], %128 {strides = array<i32>} : memref<1x8x64xf32, #tpu.memory_space<vmem>>, vector<1x8x8xf32>,
    %129 = vector.extract_strided_slice %118 {offsets = [0, 72], sizes = [8, 15], strides = [1, 1]} : vector<8x267xf32> to vector<8x15xf32>
    %cst_125 = arith.constant dense<0.000000e+00> : vector<8x8xf32>
    %130 = tpu.matmul %129, %6, %cst_125 {dimension_numbers = #tpu.dot_dimension_numbers<[1], [0], [0], [1], [0, 0, 1, 1], [], []>} : vector<8x15xf32>, vector<15x8xf32>, vector<8x8xf32> -> vector<8x8xf32>
    %c0_126 = arith.constant 0 : index
    %c0_127 = arith.constant 0 : index
    %c16 = arith.constant 16 : index
    %131 = vector.load %arg3[%c0_126, %c0_127, %c16] : memref<1x8x64xf32, #tpu.memory_space<vmem>>, vector<1x8x8xf32>
    %132 = vector.shape_cast %131 : vector<1x8x8xf32> to vector<8x8xf32>
    %133 = vector.shape_cast %130 : vector<8x8xf32> to vector<1x8x8xf32>
    tpu.vector_store %arg3[%c0_126, %c0_127, %c16], %133 {strides = array<i32>} : memref<1x8x64xf32, #tpu.memory_space<vmem>>, vector<1x8x8xf32>,
    %134 = vector.extract_strided_slice %118 {offsets = [0, 108], sizes = [8, 15], strides = [1, 1]} : vector<8x267xf32> to vector<8x15xf32>
    %cst_128 = arith.constant dense<0.000000e+00> : vector<8x8xf32>
    %135 = tpu.matmul %134, %6, %cst_128 {dimension_numbers = #tpu.dot_dimension_numbers<[1], [0], [0], [1], [0, 0, 1, 1], [], []>} : vector<8x15xf32>, vector<15x8xf32>, vector<8x8xf32> -> vector<8x8xf32>
    %c0_129 = arith.constant 0 : index
    %c0_130 = arith.constant 0 : index
    %c24 = arith.constant 24 : index
    %136 = vector.load %arg3[%c0_129, %c0_130, %c24] : memref<1x8x64xf32, #tpu.memory_space<vmem>>, vector<1x8x8xf32>
    %137 = vector.shape_cast %136 : vector<1x8x8xf32> to vector<8x8xf32>
    %138 = vector.shape_cast %135 : vector<8x8xf32> to vector<1x8x8xf32>
    tpu.vector_store %arg3[%c0_129, %c0_130, %c24], %138 {strides = array<i32>} : memref<1x8x64xf32, #tpu.memory_space<vmem>>, vector<1x8x8xf32>,
    %139 = vector.extract_strided_slice %118 {offsets = [0, 144], sizes = [8, 15], strides = [1, 1]} : vector<8x267xf32> to vector<8x15xf32>
    %cst_131 = arith.constant dense<0.000000e+00> : vector<8x8xf32>
    %140 = tpu.matmul %139, %6, %cst_131 {dimension_numbers = #tpu.dot_dimension_numbers<[1], [0], [0], [1], [0, 0, 1, 1], [], []>} : vector<8x15xf32>, vector<15x8xf32>, vector<8x8xf32> -> vector<8x8xf32>
    %c0_132 = arith.constant 0 : index
    %c0_133 = arith.constant 0 : index
    %c32 = arith.constant 32 : index
    %141 = vector.load %arg3[%c0_132, %c0_133, %c32] : memref<1x8x64xf32, #tpu.memory_space<vmem>>, vector<1x8x8xf32>
    %142 = vector.shape_cast %141 : vector<1x8x8xf32> to vector<8x8xf32>
    %143 = vector.shape_cast %140 : vector<8x8xf32> to vector<1x8x8xf32>
    tpu.vector_store %arg3[%c0_132, %c0_133, %c32], %143 {strides = array<i32>} : memref<1x8x64xf32, #tpu.memory_space<vmem>>, vector<1x8x8xf32>,
    %144 = vector.extract_strided_slice %118 {offsets = [0, 180], sizes = [8, 15], strides = [1, 1]} : vector<8x267xf32> to vector<8x15xf32>
    %cst_134 = arith.constant dense<0.000000e+00> : vector<8x8xf32>
    %145 = tpu.matmul %144, %6, %cst_134 {dimension_numbers = #tpu.dot_dimension_numbers<[1], [0], [0], [1], [0, 0, 1, 1], [], []>} : vector<8x15xf32>, vector<15x8xf32>, vector<8x8xf32> -> vector<8x8xf32>
    %c0_135 = arith.constant 0 : index
    %c0_136 = arith.constant 0 : index
    %c40 = arith.constant 40 : index
    %146 = vector.load %arg3[%c0_135, %c0_136, %c40] : memref<1x8x64xf32, #tpu.memory_space<vmem>>, vector<1x8x8xf32>
    %147 = vector.shape_cast %146 : vector<1x8x8xf32> to vector<8x8xf32>
    %148 = vector.shape_cast %145 : vector<8x8xf32> to vector<1x8x8xf32>
    tpu.vector_store %arg3[%c0_135, %c0_136, %c40], %148 {strides = array<i32>} : memref<1x8x64xf32, #tpu.memory_space<vmem>>, vector<1x8x8xf32>,
    %149 = vector.extract_strided_slice %118 {offsets = [0, 216], sizes = [8, 15], strides = [1, 1]} : vector<8x267xf32> to vector<8x15xf32>
    %cst_137 = arith.constant dense<0.000000e+00> : vector<8x8xf32>
    %150 = tpu.matmul %149, %6, %cst_137 {dimension_numbers = #tpu.dot_dimension_numbers<[1], [0], [0], [1], [0, 0, 1, 1], [], []>} : vector<8x15xf32>, vector<15x8xf32>, vector<8x8xf32> -> vector<8x8xf32>
    %c0_138 = arith.constant 0 : index
    %c0_139 = arith.constant 0 : index
    %c48 = arith.constant 48 : index
    %151 = vector.load %arg3[%c0_138, %c0_139, %c48] : memref<1x8x64xf32, #tpu.memory_space<vmem>>, vector<1x8x8xf32>
    %152 = vector.shape_cast %151 : vector<1x8x8xf32> to vector<8x8xf32>
    %153 = vector.shape_cast %150 : vector<8x8xf32> to vector<1x8x8xf32>
    tpu.vector_store %arg3[%c0_138, %c0_139, %c48], %153 {strides = array<i32>} : memref<1x8x64xf32, #tpu.memory_space<vmem>>, vector<1x8x8xf32>,
    %154 = vector.extract_strided_slice %118 {offsets = [0, 252], sizes = [8, 15], strides = [1, 1]} : vector<8x267xf32> to vector<8x15xf32>
    %cst_140 = arith.constant dense<0.000000e+00> : vector<8x8xf32>
    %155 = tpu.matmul %154, %6, %cst_140 {dimension_numbers = #tpu.dot_dimension_numbers<[1], [0], [0], [1], [0, 0, 1, 1], [], []>} : vector<8x15xf32>, vector<15x8xf32>, vector<8x8xf32> -> vector<8x8xf32>
    %c0_141 = arith.constant 0 : index
    %c0_142 = arith.constant 0 : index
    %c56 = arith.constant 56 : index
    %156 = vector.load %arg3[%c0_141, %c0_142, %c56] : memref<1x8x64xf32, #tpu.memory_space<vmem>>, vector<1x8x8xf32>
    %157 = vector.shape_cast %156 : vector<1x8x8xf32> to vector<8x8xf32>
    %158 = vector.shape_cast %155 : vector<8x8xf32> to vector<1x8x8xf32>
    tpu.vector_store %arg3[%c0_141, %c0_142, %c56], %158 {strides = array<i32>} : memref<1x8x64xf32, #tpu.memory_space<vmem>>, vector<1x8x8xf32>,
    %c0_143 = arith.constant 0 : index
    %c0_144 = arith.constant 0 : index
    %c0_145 = arith.constant 0 : index
    %159 = vector.load %arg3[%c0_143, %c0_144, %c0_145] : memref<1x8x64xf32, #tpu.memory_space<vmem>>, vector<1x8x64xf32>
    %160 = vector.shape_cast %159 : vector<1x8x64xf32> to vector<8x64xf32>
    %cst_146 = arith.constant dense<0.000000e+00> : vector<8xf32>
    %161 = vector.multi_reduction <add>, %160, %cst_146 [1] : vector<8x64xf32> to vector<8xf32>
    %162 = vector.shape_cast %161 : vector<8xf32> to vector<8x1xf32>
    %cst_147 = arith.constant 1.562500e-02 : f32
    %163 = vector.broadcast %cst_147 : f32 to vector<8x1xf32>
    %164 = arith.mulf %162, %163 : vector<8x1xf32>
    %165 = arith.mulf %160, %160 : vector<8x64xf32>
    %cst_148 = arith.constant dense<0.000000e+00> : vector<8xf32>
    %166 = vector.multi_reduction <add>, %165, %cst_148 [1] : vector<8x64xf32> to vector<8xf32>
    %167 = vector.shape_cast %166 : vector<8xf32> to vector<8x1xf32>
    %cst_149 = arith.constant 1.562500e-02 : f32
    %168 = vector.broadcast %cst_149 : f32 to vector<8x1xf32>
    %169 = arith.mulf %167, %168 : vector<8x1xf32>
    %170 = arith.mulf %164, %164 : vector<8x1xf32>
    %171 = arith.subf %169, %170 : vector<8x1xf32>
    %cst_150 = arith.constant 0.000000e+00 : f32
    %172 = vector.broadcast %cst_150 : f32 to vector<8x1xf32>
    %173 = arith.maximumf %171, %172 : vector<8x1xf32>
    %174 = vector.broadcast %164 : vector<8x1xf32> to vector<8x64xf32>
    %175 = arith.subf %160, %174 : vector<8x64xf32>
    %cst_151 = arith.constant 9.99999974E-6 : f32
    %176 = vector.broadcast %cst_151 : f32 to vector<8x1xf32>
    %177 = arith.addf %173, %176 : vector<8x1xf32>
    %178 = math.rsqrt %177 : vector<8x1xf32>
    %179 = vector.broadcast %178 : vector<8x1xf32> to vector<8x64xf32>
    %180 = arith.mulf %175, %179 : vector<8x64xf32>
    %cst_152 = arith.constant 0.000000e+00 : f32
    %181 = vector.broadcast %cst_152 : f32 to vector<8x64xf32>
    %182 = arith.maximumf %180, %181 : vector<8x64xf32>
    %c0_153 = arith.constant 0 : index
    %c0_154 = arith.constant 0 : index
    %c0_155 = arith.constant 0 : index
    %183 = vector.load %arg3[%c0_153, %c0_154, %c0_155] : memref<1x8x64xf32, #tpu.memory_space<vmem>>, vector<1x8x64xf32>
    %184 = vector.shape_cast %183 : vector<1x8x64xf32> to vector<8x64xf32>
    %185 = vector.shape_cast %182 : vector<8x64xf32> to vector<1x8x64xf32>
    tpu.vector_store %arg3[%c0_153, %c0_154, %c0_155], %185 {strides = array<i32>} : memref<1x8x64xf32, #tpu.memory_space<vmem>>, vector<1x8x64xf32>,
    return
  }
  func.func @transform_0(%arg0: i32) -> (i32, i32, i32, i32) {
    %c0_i32 = arith.constant 0 : i32
    %c0_i32_0 = arith.constant 0 : i32
    %c0_i32_1 = arith.constant 0 : i32
    %c0_i32_2 = arith.constant 0 : i32
    return %arg0, %c0_i32, %c0_i32_0, %c0_i32_1 : i32, i32, i32, i32
  }
  func.func @transform_1(%arg0: i32) -> (i32, i32, i32) {
    %c0_i32 = arith.constant 0 : i32
    %c0_i32_0 = arith.constant 0 : i32
    %c0_i32_1 = arith.constant 0 : i32
    %c0_i32_2 = arith.constant 0 : i32
    return %c0_i32, %c0_i32_0, %c0_i32_1 : i32, i32, i32
  }
  func.func @transform_2(%arg0: i32) -> (i32, i32, i32) {
    %c0_i32 = arith.constant 0 : i32
    %c0_i32_0 = arith.constant 0 : i32
    %c0_i32_1 = arith.constant 0 : i32
    return %arg0, %c0_i32, %c0_i32_0 : i32, i32, i32
  }
}

</mosaic_0001>

<bundles_post_ra>
// kernel: tpu_custom_call.1
= control target key start
LH: loop header
LB: loop body
LE: loop exit
PB: predicated region body
PF: predicated region fallthrough
CT: control target
= control target key end

     0   :  { %7 = vsyncpa [#allocation4], 0  ;;  %s3102_s0 = inlined_call_operand.hbm [shape: f32[2,4,16,16], index: 0, kind: input, shape index: {}]   ;;  %s3103_s1 = inlined_call_operand.vmem [shape: bf16[9,8,4], index: 1, kind: input, shape index: {}]   ;;  %s3104_s2 = inlined_call_operand.hbm [shape: f32[2,8,64], index: 2, kind: output, shape index: {}]  }
   0x1   :  { %9 = vsyncpa [#allocation4 + $0x1], 0 }
   0x2   :  { %10 = vsyncpa [#allocation5], 0 }
   0x3   :  { %12 = vsyncpa [#allocation5 + $0x1], 0  ;;  %s2532_s9 = smov 0   ;;  %s2534_s10 = smov 0  }
   0x4   :  { %s2536_s11 = smov 0   ;;  %s2538_s12 = smov 0  }
   0x5 LB: > { %s2553_s13 = sadd.s32 4294967295, %s2478_s12   ;;  %s2222_s14 = sadd.s32 4294967294, %s2478_s12   ;;  %s2478_s12 = sphi %s2538_s12, %s3120_s12   ;;  %s2474_s11 = sphi %s2536_s11, %s3119_s11   ;;  %s2470_s10 = sphi %s2534_s10, %s3118_s10   ;;  %s2466_s9 = sphi %s2532_s9, %s3117_s9  }
   0x6   : > { %s2557_s15 = sadd.s32 1, %s2478_s12   ;;  %s25_s16 = sadd.s32 1, %s2474_s11 }
   0x7   : > { %s22_s17 = ssub.s32 %s2478_s12, %s2557_s15  ;;  %p32_p0 = scmp.ne.s32.totalorder %s2474_s11, %s2470_s10 }
   0x8   : > { %p23_p1 = scmp.eq.s32.totalorder %s22_s17, 0  ;;  %p33_p2 = scmp.eq.s32.totalorder %s2478_s12, 0 }
   0x9   : > { %p38_p3 = scmp.ne.s32.totalorder %s2470_s10, %s2466_s9  ;;  %p39_p4 = scmp.eq.s32.totalorder %s2553_s13, 0 }
   0xa   : > { %s2569_s18 = scalar_select %p23_p1, %s2474_s11, %s25_s16  }
   0xb   : > { %p2571_p5 = por %p33_p2, %p32_p0  ;;  %p2575_p6 = por %p39_p4, %p38_p3 }
   0xc   : > { %p83_p7 = scmp.eq.s32.totalorder %s2553_s13, 1  ;;  %p89_p8 = scmp.eq.s32.totalorder %s2222_s14, 1 }
   0xd   : > { %p2309_p10 = scmp.lt.s32.totalorder %s2478_s12, 2  ;;  %s112_s23 = sand.u32 1, %s2474_s11  }
   0xe   : > { %p2582_p11 = por %p83_p7, %p32_p0  ;;  %p2586_p12 = por %p89_p8, %p38_p3 }
   0xf   : > { %s2296_s24 = sshll.u32 %s2478_s12, 6  ;;  %s2225_s25 = sshll.u32 %s112_s23, 6 }
  0x10   : > { %s121_s28 = scalar_lea.hbm %s3102_s0, %s2296_s24  ;;  %s116_s30 = scalar_lea.vmem [#allocation3], %s2225_s25 }
  0x11   : > { %s122_s29 = sshll.u32 %s121_s28, 4  ;;  %s124_s3 = sshll.u32 %s116_s30, 4  ;;  %s123_s29 = int_to_ptr.hbm [resolvable:$true] %s122_s29  ;;  %s125_s3 = int_to_ptr.vmem [resolvable:$true] %s124_s3 }
  0x12   : > { %p2597_p13 = pnand %p2309_p10, %p2571_p5  ;;  %p2228_p0 = scmp.ge.s32.totalorder %s2478_s12, 1 }
  0x13   : > { %p132_p1 = scmp.lt.s32.totalorder %s2478_s12, 3  ;;  %s113_s5 = scalar_lea.sflag [#allocation4], %s112_s23 }
  0x14   : > { %s2382_s6 = sshra.s32 %s123_s29, 4  ;;  %p2386_p3 = pneg %p2597_p13  ;;  %s2383_s6 = int_to_ptr.hbm [resolvable:$true] %s2382_s6 }
  0x15   : > { %s2384_s7 = scalar_lea.hbm %s2383_s6, 64  ;;  %s2389_s16 = scalar_lea.hbm %s3102_s0, 128 }
  0x16   : > { %p2385_p2 = scmp.ne.s32.totalorder %s2383_s6, %s2384_s7  ;;  %p2390_p5 = scmp.lt.s32.totalorder %s2383_s6, %s3102_s0 }
  0x17   : > { %p2391_p8 = scmp.lt.s32.totalorder %s2389_s16, %s2384_s7 }
  0x18   : > { %p2387_p4 = pnand %p2386_p3, %p2385_p2 }
  0x19   : > { %p2392_p10 = por %p2391_p8, %p2390_p5 }
  0x1a   : > { %p2388_p7 = pneg %p2387_p4 }
  0x1c   : > { %p2393_p9 = pnand %p2392_p10, %p2388_p7 }
  0x1e   : > { %2396 = shalt.err (!%p2393_p9)
}
  0x1f   : > { %s2480_s23 = smov 128   ;;  %s2481_s24 = smov 8  }
  0x20   : > { %2304 = dma.hbm_to_vmem [thread:$0]  (!%p2597_p13), %s123_s29, 1024, %s125_s3, %s113_s5, %s2480_s23, %s2480_s23, %s2481_s24  }
  0x21   : > { %p133_p2 = pnand %p2228_p0, %p132_p1 }
  0x22   : > { %s2618_s25 = sand.u32 (!%p133_p2), 1, %s2470_s10  }
  0x23   : > { %136 = sbr.rel (%p133_p2) target bundleno = 1201 (0x4b1), region = 28  ;;  %s2229_s26 = sshll.u32 (!%p133_p2), %s2618_s25, 6 }
  0x24   : > { %s139_s27 = scalar_lea.sflag (!%p133_p2), [#allocation4], %s2618_s25  ;;  %s2622_s28 = scalar_lea.vmem (!%p133_p2), [#allocation3], %s2229_s26 }
  0x28   : > { %2457 = dma.done.wait (%p2575_p6), %s139_s27, 1024  }
  0x29   : > { %2459 = vsyncadd (%p2575_p6), %s139_s27, 4294966272  ;;  %v200_v0 = vld [vmem:[%s2622_s28] sm:$0x1]  ;;  %v201_v1 = vld [vmem:[%s2622_s28 + $0x10] sm:$0x1]  ;;  %vm194_vm0 = vcmask 1041408  }
  0x2a   : > { %v202_v2 = vld [vmem:[%s2622_s28 + $0x20] sm:$0x1]  ;;  %v203_v3 = vld [vmem:[%s2622_s28 + $0x30] sm:$0x1]  ;;  %v204_v4 = vpack.c.bf16 %v200_v0, %v200_v0  ;;  %v205_v5 = vpack.c.bf16 %v201_v1, %v201_v1  ;;  %v267_v7 = vld [vmem:[%s2622_s28 + $0x1] sm:$0x1] }
  0x2b   : > { %v206_v6 = vpack.c.bf16 %v202_v2, %v202_v2  ;;  %v268_v8 = vld [vmem:[%s2622_s28 + $0x11] sm:$0x1]  ;;  %v207_v9 = vpack.c.bf16 %v203_v3, %v203_v3  ;;  %v269_v10 = vld [vmem:[%s2622_s28 + $0x21] sm:$0x1]  ;;  %v271_v15 = vpack.c.bf16 %v267_v7, %v267_v7  ;;  %v331_v26 = vld [vmem:[%s2622_s28 + $0x2] sm:$0x1] }
  0x2c   : > { %v212_v11 = vrot.slane %v204_v4, 2  ;;  %v213_v12 = vrot.slane %v205_v5, 2  ;;  %v270_v14 = vld [vmem:[%s2622_s28 + $0x31] sm:$0x1]  ;;  %v272_v17 = vpack.c.bf16 %v268_v8, %v268_v8  ;;  %v273_v21 = vpack.c.bf16 %v269_v10, %v269_v10  ;;  %v332_v28 = vld [vmem:[%s2622_s28 + $0x12] sm:$0x1] }
  0x2d   : > { %v214_v13 = vrot.slane %v206_v6, 2  ;;  %v215_v16 = vrot.slane %v207_v9, 2  ;;  %v274_v23 = vpack.c.bf16 %v270_v14, %v270_v14  ;;  %v279_v24 = vrot.slane %v271_v15, 2  ;;  %v333_v30 = vld [vmem:[%s2622_s28 + $0x22] sm:$0x1]  ;;  %s2482_s20 = smov 19  }
  0x2e   : > { %v218_v18 = vsel %vm194_vm0, %v204_v4, %v212_v11  ;;  %v221_v19 = vsel %vm194_vm0, %v205_v5, %v213_v12  ;;  %v280_v25 = vrot.slane %v272_v17, 2  ;;  %v281_v27 = vrot.slane %v273_v21, 2  ;;  %v334_v32 = vld [vmem:[%s2622_s28 + $0x32] sm:$0x1]  ;;  %v395_v39 = vld [vmem:[%s2622_s28 + $0x3] sm:$0x1] }
  0x2f   : > { %v224_v20 = vsel %vm194_vm0, %v206_v6, %v214_v13  ;;  %v227_v22 = vsel %vm194_vm0, %v207_v9, %v215_v16  ;;  %228 = vst [vmem:[#allocation1] ss:$2 sm:$0xff] %v218_v18  ;;  %v282_v29 = vrot.slane %v274_v23, 2  ;;  %v285_v31 = vsel %vm194_vm0, %v271_v15, %v279_v24  ;;  %v396_v43 = vld [vmem:[%s2622_s28 + $0x13] sm:$0x1]  ;;  %s2483_s29 = smov 37  }
  0x30   : > { %232 = vst [vmem:[#allocation1 + $0x10] ss:$2 sm:$0xff] %v221_v19  ;;  %v335_v33 = vpack.c.bf16 %v331_v26, %v331_v26  ;;  %v288_v34 = vsel %vm194_vm0, %v272_v17, %v280_v25  ;;  %v336_v35 = vpack.c.bf16 %v332_v28, %v332_v28  ;;  %v291_v37 = vsel %vm194_vm0, %v273_v21, %v281_v27  ;;  %v397_v56 = vld [vmem:[%s2622_s28 + $0x23] sm:$0x1]  ;;  %v398_v61 = vld [vmem:[%s2622_s28 + $0x33] sm:$0x1] }
  0x31   : > { %236 = vst [vmem:[#allocation1 + $0x20] ss:$2 sm:$0xff] %v224_v20  ;;  %v337_v38 = vpack.c.bf16 %v333_v30, %v333_v30  ;;  %vm248_vm1 = vcmask 1041409   ;;  %v294_v41 = vsel %vm194_vm0, %v274_v23, %v282_v29  ;;  %v338_v42 = vpack.c.bf16 %v334_v32, %v334_v32  ;;  %v459_v5 = vld [vmem:[%s2622_s28 + $0x4] sm:$0x1]  ;;  %s2484_s30 = smov 55  }
  0x32   : > { %240 = vst [vmem:[#allocation1 + $0x30] ss:$2 sm:$0xff] %v227_v22  ;;  %v343_v47 = vrot.slane %v335_v33, 2  ;;  %v344_v50 = vrot.slane %v336_v35, 2  ;;  %vm251_vm2 = vcmask 1042434   ;;  %vm254_vm3 = vcmask 1043459  }
  0x33   : > { %v345_v53 = vrot.slane %v337_v38, 2  ;;  %v346_v55 = vrot.slane %v338_v42, 2  ;;  %v399_v57 = vpack.c.bf16 %v395_v39, %v395_v39  ;;  %v400_v62 = vpack.c.bf16 %v396_v43, %v396_v43  ;;  %v460_v11 = vld [vmem:[%s2622_s28 + $0x14] sm:$0x1]  ;;  %v461_v25 = vld [vmem:[%s2622_s28 + $0x24] sm:$0x1] }
  0x34   : > { %v349_v60 = vsel %vm194_vm0, %v335_v33, %v343_v47  ;;  %v352_v0 = vsel %vm194_vm0, %v336_v35, %v344_v50  ;;  %v401_v4 = vpack.c.bf16 %v397_v56, %v397_v56  ;;  %v402_v9 = vpack.c.bf16 %v398_v61, %v398_v61  ;;  %v462_v30 = vld [vmem:[%s2622_s28 + $0x34] sm:$0x1]  ;;  %s2485_s3 = smov 73   ;;  %s2486_s4 = smov 109  }
  0x35   : > { %v355_v3 = vsel %vm194_vm0, %v337_v38, %v345_v53  ;;  %v358_v8 = vsel %vm194_vm0, %v338_v42, %v346_v55  ;;  %v407_v10 = vrot.slane %v399_v57, 2  ;;  %v408_v15 = vrot.slane %v400_v62, 2  ;;  %v523_v38 = vld [vmem:[%s2622_s28 + $0x5] sm:$0x1]  ;;  %s2487_s5 = smov 17   ;;  %s2488_s6 = smov 91  }
  0x36   : > { %v229_v36 = vld.sshfl [vmem:[#allocation1] sm:$0xff pattern:$0x75643120]  ;;  %v409_v21 = vrot.slane %v401_v4, 2  ;;  %v410_v24 = vrot.slane %v402_v9, 2  ;;  %v463_v26 = vpack.c.bf16 %v459_v5, %v459_v5  ;;  %v466_v42 = vpack.c.bf16 %v462_v30, %v462_v30  ;;  %s2489_s7 = smov 53  }
  0x37   : > { %v233_v40 = vld.sshfl [vmem:[#allocation1 + $0x10] sm:$0xff pattern:$0x75643120]  ;;  %295 = vst [vmem:[#allocation1] ss:$2 sm:$0xff] %v285_v31  ;;  %v243_v45 = vunpack.c.l.b16 %v229_v36  ;;  %v413_v29 = vsel %vm194_vm0, %v399_v57, %v407_v10  ;;  %v464_v31 = vpack.c.bf16 %v460_v11, %v460_v11  ;;  %v416_v33 = vsel %vm194_vm0, %v400_v62, %v408_v15  ;;  %s2490_s8 = smov 71  }
  0x38   : > { %v237_v44 = vld.sshfl [vmem:[#allocation1 + $0x20] sm:$0xff pattern:$0x75643120]  ;;  %v244_v46 = vunpack.c.l.b16 %v233_v40  ;;  %299 = vst [vmem:[#allocation1 + $0x10] ss:$2 sm:$0xff] %v288_v34  ;;  %v419_v36 = vsel %vm194_vm0, %v401_v4, %v409_v21  ;;  %v471_v43 = vrot.slane %v463_v26, 2 }
  0x39   : > { %v241_v48 = vld.sshfl [vmem:[#allocation1 + $0x30] sm:$0xff pattern:$0x75643120]  ;;  %v245_v49 = vunpack.c.l.b16 %v237_v44  ;;  %303 = vst [vmem:[#allocation1 + $0x20] ss:$2 sm:$0xff] %v291_v37  ;;  %v465_v37 = vpack.c.bf16 %v461_v25, %v461_v25  ;;  %v474_v57 = vrot.slane %v466_v42, 2 }
  0x3a   : > { %v246_v51 = vunpack.c.l.b16 %v241_v48  ;;  %v247_v52 = vrot.slane %v244_v46, 7  ;;  %307 = vst [vmem:[#allocation1 + $0x30] ss:$2 sm:$0xff] %v294_v41  ;;  %v422_v41 = vsel %vm194_vm0, %v402_v9, %v410_v24  ;;  %v524_v44 = vld [vmem:[%s2622_s28 + $0x15] sm:$0x1]  ;;  %v472_v48 = vrot.slane %v464_v31, 2 }
  0x3b   : > { %v250_v54 = vrot.slane %v245_v49, 6  ;;  %v477_v62 = vsel %vm194_vm0, %v463_v26, %v471_v43  ;;  %v486_v10 = vsel %vm194_vm0, %v466_v42, %v474_v57  ;;  %s2491_s14 = smov 127   ;;  %s2492_s16 = smov 89   ;;  %vm195_vm4 = vcmask 1043458  }
  0x3c   : > { %v249_v58 = vsel %vm248_vm1, %v247_v52, %v243_v45  ;;  %v253_v59 = vrot.slane %v246_v51, 5  ;;  %vm2859_vm5 = vmor %vm195_vm4, %vm194_vm0  ;;  %vm197_vm6 = vcmask 553988   ;;  %s2493_s17 = smov 35   ;;  %s2495_s19 = smov 107   ;;  %vm265_vm8 = vcmask 279704  }
  0x3d   : > { %v252_v63 = vsel %vm251_vm2, %v250_v54, %v249_v58  ;;  %v473_v54 = vrot.slane %v465_v37, 2  ;;  %v525_v58 = vld [vmem:[%s2622_s28 + $0x25] sm:$0x1]  ;;  %vm2869_vm7 = vmor %vm197_vm6, %vm2859_vm5  ;;  %s2496_s23 = smov 125   ;;  %s2497_s24 = smov 15   ;;  %vm329_vm9 = vcmask 427304  }
  0x3e   : > { %v255_v1 = vsel %vm254_vm3, %v253_v59, %v252_v63  ;;  %v296_v2 = vld.sshfl [vmem:[#allocation1] sm:$0xff pattern:$0x75643120]  ;;  %v527_v59 = vpack.c.bf16 %v523_v38, %v523_v38  ;;  %s2498_s26 = smov 33   ;;  %vm393_vm10 = vcmask 574904   ;;  %vm457_vm11 = vcmask 722504  }
  0x3f   : > { %v256_v6 = vpack.c.b16 %v255_v1, %v255_v1  ;;  %v300_v7 = vld.sshfl [vmem:[#allocation1 + $0x10] sm:$0xff pattern:$0x75643120]  ;;  %359 = vst [vmem:[#allocation1] ss:$2 sm:$0xff] %v349_v60  ;;  %v310_v13 = vunpack.c.l.b16 %v296_v2  ;;  %v480_v2 = vsel %vm194_vm0, %v464_v31, %v472_v48  ;;  %v483_v5 = vsel %vm194_vm0, %v465_v37, %v473_v54  ;;  %s2499_s27 = smov 126  }
  0x40   : > { %v304_v12 = vld.sshfl [vmem:[#allocation1 + $0x20] sm:$0xff pattern:$0x75643120]  ;;  %363 = vst [vmem:[#allocation1 + $0x10] ss:$2 sm:$0xff] %v352_v0  ;;  %v311_v14 = vunpack.c.l.b16 %v300_v7  ;;  %v528_v0 = vpack.c.bf16 %v524_v44, %v524_v44  ;;  %vm521_vm12 = vcmask 870104  }
  0x41   : > { %v257_v16 = vrot.slane %v256_v6, 2  ;;  %v308_v17 = vld.sshfl [vmem:[#allocation1 + $0x30] sm:$0xff pattern:$0x75643120]  ;;  %367 = vst [vmem:[#allocation1 + $0x20] ss:$2 sm:$0xff] %v355_v3  ;;  %v312_v18 = vunpack.c.l.b16 %v304_v12 }
  0x42   : > { %371 = vst [vmem:[#allocation1 + $0x30] ss:$2 sm:$0xff] %v358_v8  ;;  %v313_v19 = vunpack.c.l.b16 %v308_v17  ;;  %v314_v20 = vrot.slane %v311_v14, 7  ;;  %v526_v63 = vld [vmem:[%s2622_s28 + $0x35] sm:$0x1]  ;;  %v535_v12 = vrot.slane %v527_v59, 2 }
  0x43   : > { %v260_v22 = vsel %vm194_vm0, %v256_v6, %v257_v16  ;;  %v316_v23 = vrot.slane %v312_v18, 6  ;;  %v529_v6 = vpack.c.bf16 %v525_v58, %v525_v58  ;;  %v587_v7 = vld [vmem:[%s2622_s28 + $0x6] sm:$0x1]  ;;  %v530_v11 = vpack.c.bf16 %v526_v63, %v526_v63  ;;  %v658_v54 = vld [vmem:[%s2622_s28 + $0x27] sm:$0x1] }
  0x44   : > { %262 = vrot.lane.b32.xlu0 %v260_v22, %s2482_s20  ;;  %v315_v27 = vsel %vm248_vm1, %v314_v20, %v310_v13  ;;  %v318_v28 = vrot.slane %v313_v19, 5  ;;  %v588_v13 = vld [vmem:[%s2622_s28 + $0x16] sm:$0x1]  ;;  %v536_v17 = vrot.slane %v528_v0, 2  ;;  %v541_v31 = vsel %vm194_vm0, %v527_v59, %v535_v12  ;;  %v721_v63 = vld [vmem:[%s2622_s28 + $0x18] sm:$0x1] }
  0x45   : > { %v317_v32 = vsel %vm251_vm2, %v316_v23, %v315_v27  ;;  %v537_v23 = vrot.slane %v529_v6, 2  ;;  %v538_v26 = vrot.slane %v530_v11, 2  ;;  %v589_v27 = vld [vmem:[%s2622_s28 + $0x26] sm:$0x1]  ;;  %vm585_vm13 = vcmask 1017704   ;;  %s2501_s20 = smov 108  }
  0x46   : > { %v360_v34 = vld.sshfl [vmem:[#allocation1] sm:$0xff pattern:$0x75643120]  ;;  %v319_v35 = vsel %vm254_vm3, %v318_v28, %v317_v32  ;;  %v591_v28 = vpack.c.bf16 %v587_v7, %v587_v7  ;;  %vm652_vm14 = vcmask 1042424   ;;  %vm653_vm15 = vcmask 117762  }
  0x47   : > { %v364_v39 = vld.sshfl [vmem:[#allocation1 + $0x10] sm:$0xff pattern:$0x75643120]  ;;  %v320_v40 = vpack.c.b16 %v319_v35, %v319_v35  ;;  %423 = vst [vmem:[#allocation1] ss:$2 sm:$0xff] %v413_v29  ;;  %v374_v46 = vunpack.c.l.b16 %v360_v34  ;;  %v544_v35 = vsel %vm194_vm0, %v528_v0, %v536_v17  ;;  %v547_v38 = vsel %vm194_vm0, %v529_v6, %v537_v23 }
  0x48   : > { %v368_v45 = vld.sshfl [vmem:[#allocation1 + $0x20] sm:$0xff pattern:$0x75643120]  ;;  %v375_v47 = vunpack.c.l.b16 %v364_v39  ;;  %427 = vst [vmem:[#allocation1 + $0x10] ss:$2 sm:$0xff] %v416_v33  ;;  %v592_v33 = vpack.c.bf16 %v588_v13, %v588_v13  ;;  %v593_v39 = vpack.c.bf16 %v589_v27, %v589_v27  ;;  %v550_v42 = vsel %vm194_vm0, %v530_v11, %v538_v26 }
  0x49   : > { %v372_v49 = vld.sshfl [vmem:[#allocation1 + $0x30] sm:$0xff pattern:$0x75643120]  ;;  %v376_v50 = vunpack.c.l.b16 %v368_v45  ;;  %v321_v51 = vrot.slane %v320_v40, 2  ;;  %431 = vst [vmem:[#allocation1 + $0x20] ss:$2 sm:$0xff] %v419_v36  ;;  %v725_v17 = vpack.c.bf16 %v721_v63, %v721_v63 }
  0x4a   : > { %v377_v52 = vunpack.c.l.b16 %v372_v49  ;;  %v378_v53 = vrot.slane %v375_v47, 7  ;;  %435 = vst [vmem:[#allocation1 + $0x30] ss:$2 sm:$0xff] %v422_v41  ;;  %v590_v32 = vld [vmem:[%s2622_s28 + $0x36] sm:$0x1]  ;;  %v599_v44 = vrot.slane %v591_v28, 2 }
  0x4b   : > { %v380_v55 = vrot.slane %v376_v50, 6  ;;  %v324_v56 = vsel %vm194_vm0, %v320_v40, %v321_v51  ;;  %v594_v43 = vpack.c.bf16 %v590_v32, %v590_v32  ;;  %v656_v45 = vld [vmem:[%s2622_s28 + $0x7] sm:$0x1]  ;;  %v600_v47 = vrot.slane %v592_v33, 2  ;;  %v657_v51 = vld [vmem:[%s2622_s28 + $0x17] sm:$0x1] }
  0x4c   : > { %v379_v60 = vsel %vm248_vm1, %v378_v53, %v374_v46  ;;  %v382_v61 = vrot.slane %v377_v52, 5  ;;  %326 = vrot.lane.b32.xlu0 %v324_v56, %s2483_s29  ;;  %v601_v50 = vrot.slane %v593_v39, 2  ;;  %v659_v56 = vld [vmem:[%s2622_s28 + $0x37] sm:$0x1]  ;;  %v660_v57 = vpack.c.bf16 %v656_v45, %v656_v45  ;;  %v786_v26 = vld [vmem:[%s2622_s28 + $0x29] sm:$0x1] }
  0x4d   : > { %v381_v1 = vsel %vm251_vm2, %v380_v55, %v379_v60  ;;  %v602_v53 = vrot.slane %v594_v43, 2  ;;  %v605_v55 = vsel %vm194_vm0, %v591_v28, %v599_v44  ;;  %v608_v58 = vsel %vm194_vm0, %v592_v33, %v600_v47  ;;  %s2502_s29 = smov 92  }
  0x4e   : > { %v383_v3 = vsel %vm254_vm3, %v382_v61, %v381_v1  ;;  %v424_v4 = vld.sshfl [vmem:[#allocation1] sm:$0xff pattern:$0x75643120]  ;;  %v661_v59 = vpack.c.bf16 %v657_v51, %v657_v51  ;;  %v611_v61 = vsel %vm194_vm0, %v593_v39, %v601_v50  ;;  %v668_v7 = vrot.slane %v660_v57, 2 }
  0x4f   : > { %v384_v8 = vpack.c.b16 %v383_v3, %v383_v3  ;;  %v428_v9 = vld.sshfl [vmem:[#allocation1 + $0x10] sm:$0xff pattern:$0x75643120]  ;;  %487 = vst [vmem:[#allocation1] ss:$2 sm:$0xff] %v477_v62  ;;  %v438_v15 = vunpack.c.l.b16 %v424_v4  ;;  %v662_v62 = vpack.c.bf16 %v658_v54, %v658_v54  ;;  %v614_v1 = vsel %vm194_vm0, %v594_v43, %v602_v53 }
  0x50   : > { %v432_v14 = vld.sshfl [vmem:[#allocation1 + $0x20] sm:$0xff pattern:$0x75643120]  ;;  %v439_v16 = vunpack.c.l.b16 %v428_v9  ;;  %491 = vst [vmem:[#allocation1 + $0x10] ss:$2 sm:$0xff] %v480_v2  ;;  %v663_v2 = vpack.c.bf16 %v659_v56, %v659_v56  ;;  %v790_v45 = vpack.c.bf16 %v786_v26, %v786_v26  ;;  %vm782_vm4 = vcmask 410904  }
  0x51   : > { %v385_v18 = vrot.slane %v384_v8, 2  ;;  %v436_v19 = vld.sshfl [vmem:[#allocation1 + $0x30] sm:$0xff pattern:$0x75643120]  ;;  %v440_v20 = vunpack.c.l.b16 %v432_v14  ;;  %495 = vst [vmem:[#allocation1 + $0x20] ss:$2 sm:$0xff] %v483_v5 }
  0x52   : > { %v441_v21 = vunpack.c.l.b16 %v436_v19  ;;  %v442_v22 = vrot.slane %v439_v16, 7  ;;  %499 = vst [vmem:[#allocation1 + $0x30] ss:$2 sm:$0xff] %v486_v10  ;;  %v720_v3 = vld [vmem:[%s2622_s28 + $0x8] sm:$0x1]  ;;  %v669_v10 = vrot.slane %v661_v59, 2 }
  0x53   : > { %v388_v24 = vsel %vm194_vm0, %v384_v8, %v385_v18  ;;  %v444_v25 = vrot.slane %v440_v20, 6  ;;  %v670_v13 = vrot.slane %v662_v62, 2  ;;  %v722_v16 = vld [vmem:[%s2622_s28 + $0x28] sm:$0x1]  ;;  %v674_v20 = vsel %vm194_vm0, %v660_v57, %v668_v7  ;;  %v787_v50 = vld [vmem:[%s2622_s28 + $0x39] sm:$0x1] }
  0x54   : > { %390 = vrot.lane.b32.xlu1 %v388_v24, %s2484_s30  ;;  %v443_v29 = vsel %vm248_vm1, %v442_v22, %v438_v15  ;;  %v446_v30 = vrot.slane %v441_v21, 5  ;;  %v671_v15 = vrot.slane %v663_v2, 2  ;;  %v723_v21 = vld [vmem:[%s2622_s28 + $0x38] sm:$0x1]  ;;  %v724_v22 = vpack.c.bf16 %v720_v3, %v720_v3  ;;  %v849_v53 = vld [vmem:[%s2622_s28 + $0x1a] sm:$0x1] }
  0x55   : > { %v445_v34 = vsel %vm251_vm2, %v444_v25, %v443_v29  ;;  %v677_v24 = vsel %vm194_vm0, %v661_v59, %v669_v10  ;;  %v785_v25 = vld [vmem:[%s2622_s28 + $0x19] sm:$0x1]  ;;  %v680_v29 = vsel %vm194_vm0, %v662_v62, %v670_v13  ;;  %v798_v59 = vrot.slane %v790_v45, 2  ;;  %s2503_s30 = smov 90  }
  0x56   : > { %v447_v36 = vsel %vm254_vm3, %v446_v30, %v445_v34  ;;  %v2693_v37 = vld.sshfl [vmem:[#allocation1] sm:$0xff pattern:$0x75643120]  ;;  %v726_v30 = vpack.c.bf16 %v722_v16, %v722_v16  ;;  %v683_v34 = vsel %vm194_vm0, %v663_v2, %v671_v15  ;;  %v732_v39 = vrot.slane %v724_v22, 2  ;;  %v851_v15 = vld [vmem:[%s2622_s28 + $0x3a] sm:$0x1] }
  0x57   : > { %v448_v40 = vpack.c.b16 %v447_v36, %v447_v36  ;;  %v2696_v41 = vld.sshfl [vmem:[#allocation1 + $0x10] sm:$0xff pattern:$0x75643120]  ;;  %551 = vst [vmem:[#allocation1] ss:$2 sm:$0xff] %v541_v31  ;;  %v733_v36 = vrot.slane %v725_v17, 2  ;;  %v789_v43 = vpack.c.bf16 %v785_v25, %v785_v25  ;;  %v808_v13 = vsel %vm194_vm0, %v790_v45, %v798_v59 }
  0x58   : > { %v2700_v46 = vld.sshfl [vmem:[#allocation1 + $0x20] sm:$0xff pattern:$0x75643120]  ;;  %555 = vst [vmem:[#allocation1 + $0x10] ss:$2 sm:$0xff] %v544_v35  ;;  %v727_v35 = vpack.c.bf16 %v723_v21, %v723_v21  ;;  %v734_v44 = vrot.slane %v726_v30, 2 }
  0x59   : > { %v449_v48 = vrot.slane %v448_v40, 2  ;;  %v2702_v49 = vld.sshfl [vmem:[#allocation1 + $0x30] sm:$0xff pattern:$0x75643120]  ;;  %559 = vst [vmem:[#allocation1 + $0x20] ss:$2 sm:$0xff] %v547_v38  ;;  %v741_v54 = vsel %vm194_vm0, %v725_v17, %v733_v36 }
  0x5a   : > { %563 = vst [vmem:[#allocation1 + $0x30] ss:$2 sm:$0xff] %v550_v42  ;;  %v784_v31 = vld [vmem:[%s2622_s28 + $0x9] sm:$0x1]  ;;  %v744_v57 = vsel %vm194_vm0, %v726_v30, %v734_v44  ;;  %v913_v25 = vld [vmem:[%s2622_s28 + $0x1b] sm:$0x1]  ;;  %v855_v30 = vpack.c.bf16 %v851_v15, %v851_v15 }
  0x5b   : > { %v452_v52 = vsel %vm194_vm0, %v448_v40, %v449_v48  ;;  %v735_v48 = vrot.slane %v727_v35, 2  ;;  %v788_v51 = vpack.c.bf16 %v784_v31, %v784_v31  ;;  %v978_v59 = vld [vmem:[%s2622_s28 + $0x2c] sm:$0x1]  ;;  %vm846_vm5 = vcmask 558504  }
  0x5c   : > { %454 = vrot.lane.b32.xlu1 %v452_v52, %s2485_s3  ;;  %v738_v52 = vsel %vm194_vm0, %v724_v22, %v732_v39  ;;  %vm910_vm6 = vcmask 706104  }
  0x5d   : > { %v747_v62 = vsel %vm194_vm0, %v727_v35, %v735_v48  ;;  %v796_v63 = vrot.slane %v788_v51, 2 }
  0x5e   : > { %v552_v60 = vld.sshfl [vmem:[#allocation1] sm:$0xff pattern:$0x75643120] }
  0x5f   : > { %v556_v0 = vld.sshfl [vmem:[#allocation1 + $0x10] sm:$0xff pattern:$0x75643120]  ;;  %615 = vst [vmem:[#allocation1] ss:$2 sm:$0xff] %v605_v55  ;;  %v566_v5 = vunpack.c.l.b16 %v552_v60  ;;  %v797_v55 = vrot.slane %v789_v43, 2 }
  0x60   : > { %v560_v4 = vld.sshfl [vmem:[#allocation1 + $0x20] sm:$0xff pattern:$0x75643120]  ;;  %v567_v6 = vunpack.c.l.b16 %v556_v0  ;;  %619 = vst [vmem:[#allocation1 + $0x10] ss:$2 sm:$0xff] %v608_v58  ;;  %v791_v58 = vpack.c.bf16 %v787_v50, %v787_v50  ;;  %v2743_v0 = vpack.c.bf16 %v849_v53, %v849_v53 }
  0x61   : > { %v564_v8 = vld.sshfl [vmem:[#allocation1 + $0x30] sm:$0xff pattern:$0x75643120]  ;;  %v568_v9 = vunpack.c.l.b16 %v560_v4  ;;  %623 = vst [vmem:[#allocation1 + $0x20] ss:$2 sm:$0xff] %v611_v61  ;;  %v805_v10 = vsel %vm194_vm0, %v789_v43, %v797_v55 }
  0x62   : > { %v569_v11 = vunpack.c.l.b16 %v564_v8  ;;  %v570_v12 = vrot.slane %v567_v6, 7  ;;  %627 = vst [vmem:[#allocation1 + $0x30] ss:$2 sm:$0xff] %v614_v1  ;;  %v848_v60 = vld [vmem:[%s2622_s28 + $0xa] sm:$0x1]  ;;  %v861_v16 = vrot.slane %v2743_v0, 2 }
  0x63   : > { %v572_v14 = vrot.slane %v568_v9, 6  ;;  %v852_v6 = vpack.c.bf16 %v848_v60, %v848_v60  ;;  %v799_v9 = vrot.slane %v791_v58, 2  ;;  %v915_v50 = vld [vmem:[%s2622_s28 + $0x3b] sm:$0x1]  ;;  %v977_v55 = vld [vmem:[%s2622_s28 + $0x1c] sm:$0x1] }
  0x64   : > { %v571_v18 = vsel %vm248_vm1, %v570_v12, %v566_v5  ;;  %v574_v19 = vrot.slane %v569_v11, 5  ;;  %v802_v12 = vsel %vm194_vm0, %v788_v51, %v796_v63  ;;  %v917_v51 = vpack.c.bf16 %v913_v25, %v913_v25 }
  0x65   : > { %v573_v23 = vsel %vm251_vm2, %v572_v14, %v571_v18  ;;  %v850_v14 = vld [vmem:[%s2622_s28 + $0x2a] sm:$0x1]  ;;  %v860_v22 = vrot.slane %v852_v6, 2  ;;  %v869_v60 = vsel %vm194_vm0, %v2743_v0, %v861_v16 }
  0x66   : > { %v575_v27 = vsel %vm254_vm3, %v574_v19, %v573_v23  ;;  %v2723_v28 = vld.sshfl [vmem:[#allocation1] sm:$0xff pattern:$0x75643120]  ;;  %v502_v19 = vunpack.c.l.b16 %v2693_v37  ;;  %v504_v23 = vunpack.c.l.b16 %v2700_v46  ;;  %v912_v46 = vld [vmem:[%s2622_s28 + $0xb] sm:$0x1] }
  0x67   : > { %v576_v32 = vpack.c.b16 %v575_v27, %v575_v27  ;;  %v2727_v33 = vld.sshfl [vmem:[#allocation1 + $0x10] sm:$0xff pattern:$0x75643120]  ;;  %684 = vst [vmem:[#allocation1] ss:$2 sm:$0xff] %v674_v20  ;;  %v503_v20 = vunpack.c.l.b16 %v2696_v41  ;;  %v811_v41 = vsel %vm194_vm0, %v791_v58, %v799_v9 }
  0x68   : > { %v2730_v38 = vld.sshfl [vmem:[#allocation1 + $0x20] sm:$0xff pattern:$0x75643120]  ;;  %688 = vst [vmem:[#allocation1 + $0x10] ss:$2 sm:$0xff] %v677_v24  ;;  %v505_v24 = vunpack.c.l.b16 %v2702_v49  ;;  %v508_v35 = vrot.slane %v504_v23, 6 }
  0x69   : > { %v577_v40 = vrot.slane %v576_v32, 2  ;;  %v2732_v42 = vld.sshfl [vmem:[#allocation1 + $0x30] sm:$0xff pattern:$0x75643120]  ;;  %692 = vst [vmem:[#allocation1 + $0x20] ss:$2 sm:$0xff] %v680_v29  ;;  %v854_v29 = vpack.c.bf16 %v850_v14, %v850_v14 }
  0x6a   : > { %696 = vst [vmem:[#allocation1 + $0x30] ss:$2 sm:$0xff] %v683_v34  ;;  %v506_v31 = vrot.slane %v503_v20, 7  ;;  %v510_v39 = vrot.slane %v505_v24, 5  ;;  %v976_v58 = vld [vmem:[%s2622_s28 + $0xc] sm:$0x1] }
  0x6b   : > { %v580_v47 = vsel %vm194_vm0, %v576_v32, %v577_v40  ;;  %v914_v32 = vld [vmem:[%s2622_s28 + $0x2b] sm:$0x1]  ;;  %v862_v45 = vrot.slane %v854_v29, 2  ;;  %v980_v9 = vpack.c.bf16 %v976_v58, %v976_v58 }
  0x6c   : > { %582 = vrot.lane.b32.xlu0 %v580_v47, %s2486_s4  ;;  %v507_v49 = vsel %vm248_vm1, %v506_v31, %v502_v19  ;;  %v863_v47 = vrot.slane %v855_v30, 2 }
  0x6d   : > { %v509_v44 = vsel %vm251_vm2, %v508_v35, %v507_v49 }
  0x6e   : > { %v685_v56 = vld.sshfl [vmem:[#allocation1] sm:$0xff pattern:$0x75643120]  ;;  %v511_v48 = vsel %vm254_vm3, %v510_v39, %v509_v44  ;;  %v1043_v44 = vld [vmem:[%s2622_s28 + $0x3d] sm:$0x1] }
  0x6f   : > { %v689_v61 = vld.sshfl [vmem:[#allocation1 + $0x10] sm:$0xff pattern:$0x75643120]  ;;  %748 = vst [vmem:[#allocation1] ss:$2 sm:$0xff] %v738_v52  ;;  %v699_v2 = vunpack.c.l.b16 %v685_v56  ;;  %v512_v53 = vpack.c.b16 %v511_v48, %v511_v48  ;;  %v866_v56 = vsel %vm194_vm0, %v852_v6, %v860_v22  ;;  %v988_v22 = vrot.slane %v980_v9, 2 }
  0x70   : > { %v693_v1 = vld.sshfl [vmem:[#allocation1 + $0x20] sm:$0xff pattern:$0x75643120]  ;;  %v700_v3 = vunpack.c.l.b16 %v689_v61  ;;  %752 = vst [vmem:[#allocation1 + $0x10] ss:$2 sm:$0xff] %v741_v54  ;;  %v918_v54 = vpack.c.bf16 %v914_v32, %v914_v32 }
  0x71   : > { %v697_v4 = vld.sshfl [vmem:[#allocation1 + $0x30] sm:$0xff pattern:$0x75643120]  ;;  %v701_v5 = vunpack.c.l.b16 %v693_v1  ;;  %756 = vst [vmem:[#allocation1 + $0x20] ss:$2 sm:$0xff] %v744_v57  ;;  %v916_v57 = vpack.c.bf16 %v912_v46, %v912_v46  ;;  %v513_v61 = vrot.slane %v512_v53, 2  ;;  %v872_v1 = vsel %vm194_vm0, %v854_v29, %v862_v45 }
  0x72   : > { %v702_v7 = vunpack.c.l.b16 %v697_v4  ;;  %v703_v8 = vrot.slane %v700_v3, 7  ;;  %760 = vst [vmem:[#allocation1 + $0x30] ss:$2 sm:$0xff] %v747_v62  ;;  %v919_v62 = vpack.c.bf16 %v915_v50, %v915_v50  ;;  %v925_v3 = vrot.slane %v917_v51, 2  ;;  %v979_v4 = vld [vmem:[%s2622_s28 + $0x3c] sm:$0x1] }
  0x73   : > { %v705_v11 = vrot.slane %v701_v5, 6  ;;  %v981_v5 = vpack.c.bf16 %v977_v55, %v977_v55  ;;  %v516_v6 = vsel %vm194_vm0, %v512_v53, %v513_v61  ;;  %v2786_v19 = vpack.c.bf16 %v979_v4, %v979_v4  ;;  %v1041_v29 = vld [vmem:[%s2622_s28 + $0x1d] sm:$0x1] }
  0x74   : > { %v704_v17 = vsel %vm248_vm1, %v703_v8, %v699_v2  ;;  %v707_v18 = vrot.slane %v702_v7, 5  ;;  %v875_v2 = vsel %vm194_vm0, %v855_v30, %v863_v47  ;;  %v926_v8 = vrot.slane %v918_v54, 2  ;;  %518 = vrot.lane.b32.xlu2 %v516_v6, %s2488_s6 }
  0x75   : > { %v706_v21 = vsel %vm251_vm2, %v705_v11, %v704_v17  ;;  %v927_v16 = vrot.slane %v919_v62, 2  ;;  %v989_v20 = vrot.slane %v981_v5, 2  ;;  %v933_v31 = vsel %vm194_vm0, %v917_v51, %v925_v3 }
  0x76   : > { %v708_v26 = vsel %vm254_vm3, %v707_v18, %v706_v21  ;;  %v2759_v27 = vld.sshfl [vmem:[#allocation1] sm:$0xff pattern:$0x75643120]  ;;  %v936_v32 = vsel %vm194_vm0, %v918_v54, %v926_v8  ;;  %v991_v39 = vrot.slane %v2786_v19, 2  ;;  %v994_v48 = vsel %vm194_vm0, %v980_v9, %v988_v22 }
  0x77   : > { %v709_v37 = vpack.c.b16 %v708_v26, %v708_v26  ;;  %v2762_v34 = vld.sshfl [vmem:[#allocation1 + $0x10] sm:$0xff pattern:$0x75643120]  ;;  %812 = vst [vmem:[#allocation1] ss:$2 sm:$0xff] %v802_v12  ;;  %v939_v49 = vsel %vm194_vm0, %v919_v62, %v927_v16  ;;  %v2803_v51 = vpack.c.bf16 %v1041_v29, %v1041_v29  ;;  %v631_v61 = vunpack.c.l.b16 %v2727_v33 }
  0x78   : > { %v2766_v36 = vld.sshfl [vmem:[#allocation1 + $0x20] sm:$0xff pattern:$0x75643120]  ;;  %816 = vst [vmem:[#allocation1 + $0x10] ss:$2 sm:$0xff] %v805_v10  ;;  %v982_v10 = vpack.c.bf16 %v978_v59, %v978_v59  ;;  %v1003_v22 = vsel %vm194_vm0, %v2786_v19, %v991_v39 }
  0x79   : > { %v710_v40 = vrot.slane %v709_v37, 2  ;;  %v2769_v43 = vld.sshfl [vmem:[#allocation1 + $0x30] sm:$0xff pattern:$0x75643120]  ;;  %820 = vst [vmem:[#allocation1 + $0x20] ss:$2 sm:$0xff] %v808_v13 }
  0x7a   : > { %824 = vst [vmem:[#allocation1 + $0x30] ss:$2 sm:$0xff] %v811_v41  ;;  %v924_v13 = vrot.slane %v916_v57, 2  ;;  %v990_v23 = vrot.slane %v982_v10, 2  ;;  %v1042_v41 = vld [vmem:[%s2622_s28 + $0x2d] sm:$0x1] }
  0x7b   : > { %v713_v52 = vsel %vm194_vm0, %v709_v37, %v710_v40  ;;  %v1040_v37 = vld [vmem:[%s2622_s28 + $0xd] sm:$0x1]  ;;  %v997_v40 = vsel %vm194_vm0, %v981_v5, %v989_v20  ;;  %v1047_v5 = vpack.c.bf16 %v1043_v44, %v1043_v44  ;;  %v634_v6 = vrot.slane %v631_v61, 7  ;;  %v1112_v16 = vld [vmem:[%s2622_s28 + $0x3e] sm:$0x1] }
  0x7c   : > { %715 = vrot.lane.b32.xlu1 %v713_v52, %s2487_s5  ;;  %v930_v26 = vsel %vm194_vm0, %v916_v57, %v924_v13  ;;  %v1000_v50 = vsel %vm194_vm0, %v982_v10, %v990_v23  ;;  %v1044_v55 = vpack.c.bf16 %v1040_v37, %v1040_v37  ;;  %s2507_s5 = smov 112  }
  0x7d   : > { %v1055_v23 = vrot.slane %v1047_v5, 2 }
  0x7e   : > { %v813_v63 = vld.sshfl [vmem:[#allocation1] sm:$0xff pattern:$0x75643120]  ;;  %v1052_v10 = vrot.slane %v1044_v55, 2 }
  0x7f   : > { %v817_v7 = vld.sshfl [vmem:[#allocation1 + $0x10] sm:$0xff pattern:$0x75643120]  ;;  %876 = vst [vmem:[#allocation1] ss:$2 sm:$0xff] %v866_v56  ;;  %v827_v12 = vunpack.c.l.b16 %v813_v63  ;;  %v2805_v56 = vpack.c.bf16 %v1042_v41, %v1042_v41 }
  0x80   : > { %v821_v11 = vld.sshfl [vmem:[#allocation1 + $0x20] sm:$0xff pattern:$0x75643120]  ;;  %v828_v0 = vunpack.c.l.b16 %v817_v7  ;;  %880 = vst [vmem:[#allocation1 + $0x10] ss:$2 sm:$0xff] %v869_v60  ;;  %v630_v60 = vunpack.c.l.b16 %v2723_v28 }
  0x81   : > { %v825_v14 = vld.sshfl [vmem:[#allocation1 + $0x30] sm:$0xff pattern:$0x75643120]  ;;  %v829_v15 = vunpack.c.l.b16 %v821_v11  ;;  %884 = vst [vmem:[#allocation1 + $0x20] ss:$2 sm:$0xff] %v872_v1  ;;  %v632_v1 = vunpack.c.l.b16 %v2730_v38 }
  0x82   : > { %v830_v17 = vunpack.c.l.b16 %v825_v14  ;;  %v831_v18 = vrot.slane %v828_v0, 7  ;;  %888 = vst [vmem:[#allocation1 + $0x30] ss:$2 sm:$0xff] %v875_v2  ;;  %v633_v2 = vunpack.c.l.b16 %v2732_v42  ;;  %v1110_v7 = vld [vmem:[%s2622_s28 + $0x1e] sm:$0x1]  ;;  %v1053_v42 = vrot.slane %v2803_v51, 2 }
  0x83   : > { %v833_v21 = vrot.slane %v829_v15, 6  ;;  %v636_v8 = vrot.slane %v632_v1, 6  ;;  %v1109_v11 = vld [vmem:[%s2622_s28 + $0xe] sm:$0x1]  ;;  %v635_v0 = vsel %vm248_vm1, %v634_v6, %v630_v60  ;;  %v1054_v15 = vrot.slane %v2805_v56, 2 }
  0x84   : > { %v832_v24 = vsel %vm248_vm1, %v831_v18, %v827_v12  ;;  %v835_v25 = vrot.slane %v830_v17, 5  ;;  %v638_v9 = vrot.slane %v633_v2, 5  ;;  %v1111_v12 = vld [vmem:[%s2622_s28 + $0x2e] sm:$0x1]  ;;  %v1114_v17 = vpack.c.bf16 %v1110_v7, %v1110_v7  ;;  %v1173_v1 = vld [vmem:[%s2622_s28 + $0xf] sm:$0x1] }
  0x85   : > { %v834_v30 = vsel %vm251_vm2, %v833_v21, %v832_v24  ;;  %v637_v18 = vsel %vm251_vm2, %v636_v8, %v635_v0  ;;  %v765_v2 = vunpack.c.l.b16 %v2766_v36  ;;  %v766_v7 = vunpack.c.l.b16 %v2769_v43 }
  0x86   : > { %v836_v35 = vsel %vm254_vm3, %v835_v25, %v834_v30  ;;  %v877_v46 = vld.sshfl [vmem:[#allocation1] sm:$0xff pattern:$0x75643120]  ;;  %v639_v24 = vsel %vm254_vm3, %v638_v9, %v637_v18  ;;  %v1113_v30 = vpack.c.bf16 %v1109_v11, %v1109_v11  ;;  %v1122_v19 = vrot.slane %v1114_v17, 2 }
  0x87   : > { %v837_v45 = vpack.c.b16 %v836_v35, %v836_v35  ;;  %v881_v47 = vld.sshfl [vmem:[#allocation1 + $0x10] sm:$0xff pattern:$0x75643120]  ;;  %940 = vst [vmem:[#allocation1] ss:$2 sm:$0xff] %v930_v26  ;;  %v891_v53 = vunpack.c.l.b16 %v877_v46  ;;  %v1058_v35 = vsel %vm194_vm0, %v1044_v55, %v1052_v10  ;;  %v1115_v46 = vpack.c.bf16 %v1111_v12, %v1111_v12 }
  0x88   : > { %v885_v52 = vld.sshfl [vmem:[#allocation1 + $0x20] sm:$0xff pattern:$0x75643120]  ;;  %v892_v54 = vunpack.c.l.b16 %v881_v47  ;;  %944 = vst [vmem:[#allocation1 + $0x10] ss:$2 sm:$0xff] %v933_v31  ;;  %v640_v31 = vpack.c.b16 %v639_v24, %v639_v24  ;;  %v1177_v10 = vpack.c.bf16 %v1173_v1, %v1173_v1  ;;  %v769_v0 = vrot.slane %v765_v2, 6 }
  0x89   : > { %v838_v57 = vrot.slane %v837_v45, 2  ;;  %v889_v58 = vld.sshfl [vmem:[#allocation1 + $0x30] sm:$0xff pattern:$0x75643120]  ;;  %v893_v59 = vunpack.c.l.b16 %v885_v52  ;;  %948 = vst [vmem:[#allocation1 + $0x20] ss:$2 sm:$0xff] %v936_v32 }
  0x8a   : > { %v894_v62 = vunpack.c.l.b16 %v889_v58  ;;  %v895_v63 = vrot.slane %v892_v54, 7  ;;  %952 = vst [vmem:[#allocation1 + $0x30] ss:$2 sm:$0xff] %v939_v49  ;;  %v641_v39 = vrot.slane %v640_v31, 2  ;;  %v1067_v58 = vsel %vm194_vm0, %v1047_v5, %v1055_v23 }
  0x8b   : > { %v841_v3 = vsel %vm194_vm0, %v837_v45, %v838_v57  ;;  %v897_v4 = vrot.slane %v893_v59, 6  ;;  %v1064_v57 = vsel %vm194_vm0, %v2805_v56, %v1054_v15  ;;  %v764_v59 = vunpack.c.l.b16 %v2762_v34 }
  0x8c   : > { %843 = vrot.lane.b32.xlu0 %v841_v3, %s2489_s7  ;;  %v896_v28 = vsel %vm248_vm1, %v895_v63, %v891_v53  ;;  %v899_v33 = vrot.slane %v894_v62, 5  ;;  %v1121_v53 = vrot.slane %v1113_v30, 2  ;;  %v644_v54 = vsel %vm194_vm0, %v640_v31, %v641_v39  ;;  %s2510_s7 = smov 40  }
  0x8d   : > { %v898_v38 = vsel %vm251_vm2, %v897_v4, %v896_v28  ;;  %646 = vrot.lane.b32.xlu2 %v644_v54, %s2491_s14  ;;  %v1123_v62 = vrot.slane %v1115_v46, 2  ;;  %v1130_v63 = vsel %vm194_vm0, %v1114_v17, %v1122_v19  ;;  %v763_v5 = vunpack.c.l.b16 %v2759_v27  ;;  %v1175_v27 = vld [vmem:[%s2622_s28 + $0x2f] sm:$0x1] }
  0x8e   : > { %v900_v13 = vsel %vm254_vm3, %v899_v33, %v898_v38  ;;  %v941_v14 = vld.sshfl [vmem:[#allocation1] sm:$0xff pattern:$0x75643120]  ;;  %v1127_v33 = vsel %vm194_vm0, %v1113_v30, %v1121_v53  ;;  %v767_v8 = vrot.slane %v764_v59, 7  ;;  %v1179_v23 = vpack.c.bf16 %v1175_v27, %v1175_v27 }
  0x8f   : > { %v901_v20 = vpack.c.b16 %v900_v13, %v900_v13  ;;  %v945_v21 = vld.sshfl [vmem:[#allocation1 + $0x10] sm:$0xff pattern:$0x75643120]  ;;  %1004 = vst [vmem:[#allocation1] ss:$2 sm:$0xff] %v994_v48  ;;  %v955_v26 = vunpack.c.l.b16 %v941_v14  ;;  %v2830_v48 = vpack.c.bf16 %v1112_v16, %v1112_v16  ;;  %v1133_v15 = vsel %vm194_vm0, %v1115_v46, %v1123_v62 }
  0x90   : > { %v949_v25 = vld.sshfl [vmem:[#allocation1 + $0x20] sm:$0xff pattern:$0x75643120]  ;;  %v956_v29 = vunpack.c.l.b16 %v945_v21  ;;  %1008 = vst [vmem:[#allocation1 + $0x10] ss:$2 sm:$0xff] %v997_v40  ;;  %v1061_v40 = vsel %vm194_vm0, %v2803_v51, %v1053_v42  ;;  %v768_v43 = vsel %vm248_vm1, %v767_v8, %v763_v5  ;;  %v771_v16 = vrot.slane %v766_v7, 5 }
  0x91   : > { %v902_v32 = vrot.slane %v901_v20, 2  ;;  %v953_v37 = vld.sshfl [vmem:[#allocation1 + $0x30] sm:$0xff pattern:$0x75643120]  ;;  %v957_v41 = vunpack.c.l.b16 %v949_v25  ;;  %1012 = vst [vmem:[#allocation1 + $0x20] ss:$2 sm:$0xff] %v1000_v50  ;;  %v770_v21 = vsel %vm251_vm2, %v769_v0, %v768_v43 }
  0x92   : > { %v958_v49 = vunpack.c.l.b16 %v953_v37  ;;  %v959_v44 = vrot.slane %v956_v29, 7  ;;  %1016 = vst [vmem:[#allocation1 + $0x30] ss:$2 sm:$0xff] %v1003_v22  ;;  %v1174_v51 = vld [vmem:[%s2622_s28 + $0x1f] sm:$0x1]  ;;  %v1124_v56 = vrot.slane %v2830_v48, 2  ;;  %v772_v24 = vsel %vm254_vm3, %v771_v16, %v770_v21 }
  0x93   : > { %v905_v45 = vsel %vm194_vm0, %v901_v20, %v902_v32  ;;  %v961_v47 = vrot.slane %v957_v41, 6  ;;  %v1178_v42 = vpack.c.bf16 %v1174_v51, %v1174_v51  ;;  %v1176_v20 = vld [vmem:[%s2622_s28 + $0x3f] sm:$0x1]  ;;  %v1185_v30 = vrot.slane %v1177_v10, 2  ;;  %s2500_s28 = smov 110  }
  0x94   : > { %907 = vrot.lane.b32.xlu1 %v905_v45, %s2490_s8  ;;  %v960_v50 = vsel %vm248_vm1, %v959_v44, %v955_v26  ;;  %v963_v52 = vrot.slane %v958_v49, 5  ;;  %v773_v32 = vpack.c.b16 %v772_v24, %v772_v24  ;;  %v1180_v46 = vpack.c.bf16 %v1176_v20, %v1176_v20  ;;  %s2511_s8 = smov 4  }
  0x95   : > { %v962_v55 = vsel %vm251_vm2, %v961_v47, %v960_v50  ;;  %v1186_v31 = vrot.slane %v1178_v42, 2  ;;  %v2494_v51 = vmov 0   ;;  %v1191_v59 = vsel %vm194_vm0, %v1177_v10, %v1185_v30 }
  0x96   : > { %v964_v60 = vsel %vm254_vm3, %v963_v52, %v962_v55  ;;  %v1005_v61 = vld.sshfl [vmem:[#allocation1] sm:$0xff pattern:$0x75643120]  ;;  %v774_v44 = vrot.slane %v773_v32, 2  ;;  %199 = vst.msk [vmem:[#allocation2] sm:$0x3f] %vm2869_vm7, %v2494_v51 }
  0x97   : > { %v965_v3 = vpack.c.b16 %v964_v60, %v964_v60  ;;  %v1009_v4 = vld.sshfl [vmem:[#allocation1 + $0x10] sm:$0xff pattern:$0x75643120]  ;;  %1068 = vst [vmem:[#allocation1] ss:$2 sm:$0xff] %v1058_v35  ;;  %v1019_v6 = vunpack.c.l.b16 %v1005_v61  ;;  %v1136_v35 = vsel %vm194_vm0, %v2830_v48, %v1124_v56  ;;  %v1187_v48 = vrot.slane %v1179_v23, 2 }
  0x98   : > { %v1013_v34 = vld.sshfl [vmem:[#allocation1 + $0x20] sm:$0xff pattern:$0x75643120]  ;;  %v1020_v28 = vunpack.c.l.b16 %v1009_v4  ;;  %1072 = vst [vmem:[#allocation1 + $0x10] ss:$2 sm:$0xff] %v1061_v40  ;;  %v777_v52 = vsel %vm194_vm0, %v773_v32, %v774_v44  ;;  %v1194_v62 = vsel %vm194_vm0, %v1178_v42, %v1186_v31  ;;  %vm974_vm7 = vcmask 853704  }
  0x99   : > { %v966_v9 = vrot.slane %v965_v3, 2  ;;  %v1017_v38 = vld.sshfl [vmem:[#allocation1 + $0x30] sm:$0xff pattern:$0x75643120]  ;;  %v1021_v36 = vunpack.c.l.b16 %v1013_v34  ;;  %1076 = vst [vmem:[#allocation1 + $0x20] ss:$2 sm:$0xff] %v1064_v57  ;;  %779 = vrot.lane.b32.xlu2 %v777_v52, %s2493_s17  ;;  %v1197_v2 = vsel %vm194_vm0, %v1179_v23, %v1187_v48 }
  0x9a   : > { %v1022_v11 = vunpack.c.l.b16 %v1017_v38  ;;  %v1023_v12 = vrot.slane %v1020_v28, 7  ;;  %1080 = vst [vmem:[#allocation1 + $0x30] ss:$2 sm:$0xff] %v1067_v58  ;;  %v1188_v57 = vrot.slane %v1180_v46, 2  ;;  %s2512_s17 = smov 16  }
  0x9b   : > { %v969_v13 = vsel %vm194_vm0, %v965_v3, %v966_v9  ;;  %v1025_v14 = vrot.slane %v1021_v36, 6 }
  0x9c   : > { %971 = vrot.lane.b32.xlu0 %v969_v13, %s2492_s16  ;;  %v1024_v17 = vsel %vm248_vm1, %v1023_v12, %v1019_v6  ;;  %v1027_v18 = vrot.slane %v1022_v11, 5  ;;  %v1200_v56 = vsel %vm194_vm0, %v1180_v46, %v1188_v57 }
  0x9d   : > { %v1026_v22 = vsel %vm251_vm2, %v1025_v14, %v1024_v17 }
  0x9e   : > { %v1028_v26 = vsel %vm254_vm3, %v1027_v18, %v1026_v22  ;;  %v1069_v29 = vld.sshfl [vmem:[#allocation1] sm:$0xff pattern:$0x75643120] }
  0x9f   : > { %v1029_v37 = vpack.c.b16 %v1028_v26, %v1028_v26  ;;  %v1073_v41 = vld.sshfl [vmem:[#allocation1 + $0x10] sm:$0xff pattern:$0x75643120]  ;;  %1137 = vst [vmem:[#allocation1] ss:$2 sm:$0xff] %v1127_v33  ;;  %v1083_v19 = vunpack.c.l.b16 %v1069_v29 }
  0xa0   : > { %v1077_v49 = vld.sshfl [vmem:[#allocation1 + $0x20] sm:$0xff pattern:$0x75643120]  ;;  %1141 = vst [vmem:[#allocation1 + $0x10] ss:$2 sm:$0xff] %v1130_v63  ;;  %v1084_v39 = vunpack.c.l.b16 %v1073_v41 }
  0xa1   : > { %v1030_v47 = vrot.slane %v1029_v37, 2  ;;  %v1081_v40 = vld.sshfl [vmem:[#allocation1 + $0x30] sm:$0xff pattern:$0x75643120]  ;;  %1145 = vst [vmem:[#allocation1 + $0x20] ss:$2 sm:$0xff] %v1133_v15  ;;  %v1085_v50 = vunpack.c.l.b16 %v1077_v49 }
  0xa2   : > { %1149 = vst [vmem:[#allocation1 + $0x30] ss:$2 sm:$0xff] %v1136_v35  ;;  %v1086_v53 = vunpack.c.l.b16 %v1081_v40  ;;  %v1087_v54 = vrot.slane %v1084_v39, 7 }
  0xa3   : > { %v1033_v55 = vsel %vm194_vm0, %v1029_v37, %v1030_v47  ;;  %v1089_v58 = vrot.slane %v1085_v50, 6 }
  0xa4   : > { %1035 = vrot.lane.b32.xlu1 %v1033_v55, %s2495_s19  ;;  %v1088_v60 = vsel %vm248_vm1, %v1087_v54, %v1083_v19  ;;  %v1091_v61 = vrot.slane %v1086_v53, 5  ;;  %s2513_s19 = smov 8  }
  0xa5   : > { %v1090_v63 = vsel %vm251_vm2, %v1089_v58, %v1088_v60 }
  0xa6   : > { %v1138_v1 = vld.sshfl [vmem:[#allocation1] sm:$0xff pattern:$0x75643120]  ;;  %v1092_v3 = vsel %vm254_vm3, %v1091_v61, %v1090_v63 }
  0xa7   : > { %v1142_v4 = vld.sshfl [vmem:[#allocation1 + $0x10] sm:$0xff pattern:$0x75643120]  ;;  %1201 = vst [vmem:[#allocation1] ss:$2 sm:$0xff] %v1191_v59  ;;  %v1093_v5 = vpack.c.b16 %v1092_v3, %v1092_v3  ;;  %v1152_v34 = vunpack.c.l.b16 %v1138_v1 }
  0xa8   : > { %v1146_v7 = vld.sshfl [vmem:[#allocation1 + $0x20] sm:$0xff pattern:$0x75643120]  ;;  %1205 = vst [vmem:[#allocation1 + $0x10] ss:$2 sm:$0xff] %v1194_v62  ;;  %v1153_v6 = vunpack.c.l.b16 %v1142_v4 }
  0xa9   : > { %v1150_v28 = vld.sshfl [vmem:[#allocation1 + $0x30] sm:$0xff pattern:$0x75643120]  ;;  %1209 = vst [vmem:[#allocation1 + $0x20] ss:$2 sm:$0xff] %v1197_v2  ;;  %v1094_v33 = vrot.slane %v1093_v5, 2  ;;  %v1154_v8 = vunpack.c.l.b16 %v1146_v7 }
  0xaa   : > { %1213 = vst [vmem:[#allocation1 + $0x30] ss:$2 sm:$0xff] %v1200_v56  ;;  %v1155_v9 = vunpack.c.l.b16 %v1150_v28  ;;  %v1156_v38 = vrot.slane %v1153_v6, 7 }
  0xab   : > { %v1097_v36 = vsel %vm194_vm0, %v1093_v5, %v1094_v33  ;;  %v1158_v10 = vrot.slane %v1154_v8, 6 }
  0xac   : > { %1099 = vrot.lane.b32.xlu2 %v1097_v36, %s2496_s23  ;;  %v1157_v42 = vsel %vm248_vm1, %v1156_v38, %v1152_v34  ;;  %v1160_v11 = vrot.slane %v1155_v9, 5  ;;  %s2514_s23 = smov 24  }
  0xad   : > { %v1159_v12 = vsel %vm251_vm2, %v1158_v10, %v1157_v42 }
  0xae   : > { %v1202_v27 = vld.sshfl [vmem:[#allocation1] sm:$0xff pattern:$0x75643120]  ;;  %v1161_v43 = vsel %vm254_vm3, %v1160_v11, %v1159_v12 }
  0xaf   : > { %v1206_v0 = vld.sshfl [vmem:[#allocation1 + $0x10] sm:$0xff pattern:$0x75643120]  ;;  %v1162_v13 = vpack.c.b16 %v1161_v43, %v1161_v43  ;;  %v1216_v15 = vunpack.c.l.b16 %v1202_v27 }
  0xb0   : > { %v1210_v14 = vld.sshfl [vmem:[#allocation1 + $0x20] sm:$0xff pattern:$0x75643120]  ;;  %v1217_v16 = vunpack.c.l.b16 %v1206_v0 }
  0xb1   : > { %v1214_v17 = vld.sshfl [vmem:[#allocation1 + $0x30] sm:$0xff pattern:$0x75643120]  ;;  %v1218_v18 = vunpack.c.l.b16 %v1210_v14  ;;  %v1163_v20 = vrot.slane %v1162_v13, 2 }
  0xb2   : > { %v1219_v21 = vunpack.c.l.b16 %v1214_v17  ;;  %v1220_v22 = vrot.slane %v1217_v16, 7 }
  0xb3   : > { %v1222_v23 = vrot.slane %v1218_v18, 6  ;;  %v1166_v24 = vsel %vm194_vm0, %v1162_v13, %v1163_v20 }
  0xb4   : > { %v1221_v25 = vsel %vm248_vm1, %v1220_v22, %v1216_v15  ;;  %v1224_v26 = vrot.slane %v1219_v21, 5  ;;  %1168 = vrot.lane.b32.xlu2 %v1166_v24, %s2497_s24  ;;  %vm649_vm1 = vcmask 1039360   ;;  %v177_v24 = vld [vmem:[%s3103_s1] sm:$0xf]  ;;  %s2515_s24 = smov 32  }
  0xb5   : > { %v1223_v29 = vsel %vm251_vm2, %v1222_v23, %v1221_v25  ;;  %vm654_vm2 = vmor %vm653_vm15, %vm652_vm14  ;;  %vm1235_vm14 = vcmask 394504   ;;  %vm1254_vm15 = vcmask 31744  }
  0xb6   : > { %v1225_v30 = vsel %vm254_vm3, %v1224_v26, %v1223_v29  ;;  %v263_v31 = vpop.permute.xlu0 %262  ;;  %vm718_vm3 = vcmask 263304  }
  0xb7   : > { %v1226_v32 = vpack.c.b16 %v1225_v30, %v1225_v30  ;;  %266 = vst.msk [vmem:[#allocation2] sm:$0x3] %vm265_vm8, %v263_v31  ;;  %vm1102_vm8 = vcmask 1022976  }
  0xb9   : > { %v1227_v37 = vrot.slane %v1226_v32, 2 }
  0xbb   : > { %v1230_v41 = vsel %vm194_vm0, %v1226_v32, %v1227_v37 }
  0xbc   : > { %1232 = vrot.lane.b32.xlu0 %v1230_v41, %s2498_s26  ;;  %s2516_s26 = smov 48  }
  0xbe   : > { %v327_v35 = vpop.permute.xlu0 %326 }
  0xbf   : > { %330 = vst.msk [vmem:[#allocation2] sm:$0x3] %vm329_vm9, %v327_v35  ;;  %vm1105_vm9 = vcmask 1042408  }
  0xc6   : > { %v391_v46 = vpop.permute.xlu1 %390 }
  0xc7   : > { %394 = vst.msk [vmem:[#allocation2] sm:$0x3] %vm393_vm10, %v391_v46  ;;  %vm1106_vm10 = vcmask 101378   ;;  %v2233_v46 = vld [vmem:[%s3103_s1 + $0x4] sm:$0xf] }
  0xce   : > { %v455_v49 = vpop.permute.xlu1 %454  ;;  %v519_v44 = vpop.permute.xlu2 %518 }
  0xcf   : > { %458 = vst.msk [vmem:[#allocation2] sm:$0x3] %vm457_vm11, %v455_v49  ;;  %vm1038_vm11 = vcmask 1001304  }
  0xd0   : > { %522 = vst.msk [vmem:[#allocation2] sm:$0x3] %vm521_vm12, %v519_v44  ;;  %vm1107_vm12 = vmor %vm1106_vm10, %vm1105_vm9  ;;  %vm1862_vm10 = vcmask 121856  }
  0xde   : > { %v583_v19 = vpop.permute.xlu0 %582 }
  0xdf   : > { %586 = vst.msk [vmem:[#allocation2] sm:$0x3] %vm585_vm13, %v583_v19  ;;  %vm1171_vm13 = vcmask 246904  }
  0xe7   : > { %v647_v39 = vpop.permute.xlu2 %646 }
  0xe8   : > { %v648_v45 = vrot.slane %v647_v39, 6 }
  0xea   : > { %v650_v47 = vsel %vm649_vm1, %v648_v45, %v647_v39 }
  0xeb   : > { %655 = vst.msk [vmem:[#allocation2] sm:$0xf] %vm654_vm2, %v650_v47  ;;  %vm1445_vm2 = vcmask 900096  }
  0xee   : > { %v716_v40 = vpop.permute.xlu1 %715 }
  0xef   : > { %719 = vst.msk [vmem:[#allocation2 + $0x2] sm:$0x3] %vm718_vm3, %v716_v40  ;;  %vm1517_vm3 = vcmask 891904  }
  0xf3   : > { %v780_v50 = vpop.permute.xlu2 %779 }
  0xf4   : > { %783 = vst.msk [vmem:[#allocation2 + $0x2] sm:$0x3] %vm782_vm4, %v780_v50  ;;  %vm1589_vm4 = vcmask 883712  }
  0xfe   : > { %v844_v48 = vpop.permute.xlu0 %843 }
  0xff   : > { %847 = vst.msk [vmem:[#allocation2 + $0x2] sm:$0x3] %vm846_vm5, %v844_v48  ;;  %vm1661_vm5 = vcmask 752640  }
 0x106   : > { %v908_v52 = vpop.permute.xlu1 %907  ;;  %v1100_v53 = vpop.permute.xlu2 %1099 }
 0x107   : > { %911 = vst.msk [vmem:[#allocation2 + $0x2] sm:$0x3] %vm910_vm6, %v908_v52  ;;  %v1101_v55 = vrot.slane %v1100_v53, 6  ;;  %vm1733_vm6 = vcmask 744448  }
 0x109   : > { %v1103_v57 = vsel %vm1102_vm8, %v1101_v55, %v1100_v53  ;;  %v2234_v53 = vld [vmem:[%s3103_s1 + $0x8] sm:$0xf] }
 0x10e   : > { %v972_v54 = vpop.permute.xlu0 %971  ;;  %v1169_v51 = vpop.permute.xlu2 %1168 }
 0x10f   : > { %975 = vst.msk [vmem:[#allocation2 + $0x2] sm:$0x3] %vm974_vm7, %v972_v54  ;;  %vm1805_vm7 = vcmask 736256  }
 0x116   : > { %v1036_v58 = vpop.permute.xlu1 %1035 }
 0x117   : > { %1039 = vst.msk [vmem:[#allocation2 + $0x2] sm:$0x3] %vm1038_vm11, %v1036_v58  ;;  %vm1890_vm11 = vcmask 64512  }
 0x118   : > { %1108 = vst.msk [vmem:[#allocation2 + $0x2] sm:$0xf] %vm1107_vm12, %v1103_v57  ;;  %vm1920_vm12 = vcmask 130112  }
 0x119   : > { %1172 = vst.msk [vmem:[#allocation2 + $0x4] sm:$0x3] %vm1171_vm13, %v1169_v51  ;;  %vm1950_vm13 = vcmask 195712  }
 0x12e   : > { %v1233_v59 = vpop.permute.xlu0 %1232 }
 0x12f   : > { %1236 = vst.msk [vmem:[#allocation2 + $0x4] sm:$0x3] %vm1235_vm14, %v1233_v59  ;;  %vm1980_vm14 = vcmask 261312  }
 0x136   : > { %v1237_v60 = vld [vmem:[#allocation2] sm:$0x3f] }
 0x137   : > { %1239 = vst [vmem:[#allocation1] ss:$4 sm:$0xff] %v1237_v60  ;;  %v1358_v3 = vld [vmem:[#allocation2] sm:$0x3f] }
 0x138   : > { %v1430_v34 = vld [vmem:[#allocation2] sm:$0x3f] }
 0x139   : > { %v1502_v8 = vld [vmem:[#allocation2] sm:$0x3f] }
 0x13a   : > { %v1574_v10 = vld [vmem:[#allocation2] sm:$0x3f] }
 0x13b   : > { %v1646_v27 = vld [vmem:[#allocation2] sm:$0x3f] }
 0x13c   : > { %v1718_v14 = vld [vmem:[#allocation2] sm:$0x3f] }
 0x13d   : > { %v1790_v18 = vld [vmem:[#allocation2] sm:$0x3f] }
 0x13e   : > { %v1240_v61 = vld.sshfl [vmem:[#allocation1] sm:$0xff pattern:$0x73625140]  ;;  %v1242_v62 = vld.sshfl [vmem:[#allocation1 + $0x8] sm:$0xff pattern:$0x73625140] }
 0x13f   : > { %v1244_v63 = vld.sshfl [vmem:[#allocation1 + $0x10] sm:$0xff pattern:$0x73625140]  ;;  %1248 = vrot.lane.b32.xlu2 %v1242_v62, %s2491_s14  ;;  %1246 = vrot.lane.b32.xlu1 %v1240_v61, %s2491_s14 }
 0x140   : > { %1306 = vst [vmem:[#allocation1] ss:$4 sm:$0xff] %v1237_v60  ;;  %1250 = vrot.lane.b32.xlu0 %v1244_v63, %s2491_s14  ;;  %s2230_s14 = sshll.u32 %s2618_s25, 3 }
 0x141   : > { %s3051_s16 = scalar_lea.vmem [#allocation6], %s2230_s14 }
 0x142   : > { %s2149_s3 = sshll.u32 %s3051_s16, 4  ;;  %s2150_s3 = int_to_ptr.vmem [resolvable:$true] %s2149_s3 }
 0x147   : > { %v2897_v1 = vld.sshfl [vmem:[#allocation1 + $0x8] sm:$0xff pattern:$0x73625140]  ;;  %v2899_v2 = vld.sshfl [vmem:[#allocation1 + $0x10] sm:$0xff pattern:$0x73625140] }
 0x148   : > { %v1307_v4 = vld.sshfl [vmem:[#allocation1] sm:$0xff pattern:$0x73625140]  ;;  %v1315_v35 = vsel %vm194_vm0, %v2897_v1, 0  ;;  %v1317_v49 = vsel %vm194_vm0, %v2899_v2, 0 }
 0x149   : > { %v1313_v56 = vsel %vm194_vm0, %v1307_v4, 0  ;;  %1360 = vst [vmem:[#allocation1] ss:$4 sm:$0xff] %v1358_v3  ;;  %v2235_v3 = vld [vmem:[%s3103_s1 + $0xc] sm:$0xf] }
 0x14a   : > { %1326 = vmatpush.bf16.msra.mxu3 %v1313_v56 }
 0x14d   : > { %2244 = vmatmul.msk.bf16.vlgmr.msra.gmra.mxu3 %vm1254_vm15, %v177_v24 }
 0x150   : > { %v1365_v5 = vld.sshfl [vmem:[#allocation1 + $0x10] sm:$0xff pattern:$0x73625140]  ;;  %v1363_v7 = vld.sshfl [vmem:[#allocation1 + $0x8] sm:$0xff pattern:$0x73625140] }
 0x151   : > { %1371 = vrot.lane.b32.xlu0 %v1365_v5, %s2499_s27  ;;  %1369 = vrot.lane.b32.xlu2 %v1363_v7, %s2499_s27  ;;  %v1361_v6 = vld.sshfl [vmem:[#allocation1] sm:$0xff pattern:$0x73625140] }
 0x152   : > { %1367 = vrot.lane.b32.xlu1 %v1361_v6, %s2499_s27  ;;  %1432 = vst [vmem:[#allocation1] ss:$4 sm:$0xff] %v1430_v34  ;;  %s2293_s27 = sshll.u32 %s2553_s13, 3  ;;  %s2137_s13 = scalar_lea.sflag [#allocation5], %s2618_s25 }
 0x159   : > { %v1437_v28 = vld.sshfl [vmem:[#allocation1 + $0x10] sm:$0xff pattern:$0x73625140]  ;;  %v1435_v33 = vld.sshfl [vmem:[#allocation1 + $0x8] sm:$0xff pattern:$0x73625140] }
 0x15a   : > { %1443 = vrot.lane.b32.xlu0 %v1437_v28, %s2500_s28  ;;  %1441 = vrot.lane.b32.xlu2 %v1435_v33, %s2500_s28  ;;  %v1433_v9 = vld.sshfl [vmem:[#allocation1] sm:$0xff pattern:$0x73625140] }
 0x15b   : > { %1439 = vrot.lane.b32.xlu1 %v1433_v9, %s2500_s28  ;;  %1504 = vst [vmem:[#allocation1] ss:$4 sm:$0xff] %v1502_v8 }
 0x162   : > { %v1509_v38 = vld.sshfl [vmem:[#allocation1 + $0x10] sm:$0xff pattern:$0x73625140]  ;;  %v1507_v36 = vld.sshfl [vmem:[#allocation1 + $0x8] sm:$0xff pattern:$0x73625140] }
 0x163   : > { %1515 = vrot.lane.b32.xlu0 %v1509_v38, %s2486_s4  ;;  %1513 = vrot.lane.b32.xlu2 %v1507_v36, %s2486_s4  ;;  %v1505_v42 = vld.sshfl [vmem:[#allocation1] sm:$0xff pattern:$0x73625140]  ;;  %v2236_v36 = vld [vmem:[%s3103_s1 + $0x10] sm:$0xf] }
 0x164   : > { %1511 = vrot.lane.b32.xlu1 %v1505_v42, %s2486_s4  ;;  %1576 = vst [vmem:[#allocation1] ss:$4 sm:$0xff] %v1574_v10  ;;  %s2506_s4 = smov 56  }
 0x16b   : > { %v1581_v11 = vld.sshfl [vmem:[#allocation1 + $0x10] sm:$0xff pattern:$0x73625140]  ;;  %v1579_v12 = vld.sshfl [vmem:[#allocation1 + $0x8] sm:$0xff pattern:$0x73625140] }
 0x16c   : > { %1587 = vrot.lane.b32.xlu2 %v1581_v11, %s2501_s20  ;;  %1585 = vrot.lane.b32.xlu1 %v1579_v12, %s2501_s20  ;;  %v1577_v43 = vld.sshfl [vmem:[#allocation1] sm:$0xff pattern:$0x73625140] }
 0x16d   : > { %1583 = vrot.lane.b32.xlu0 %v1577_v43, %s2501_s20  ;;  %1648 = vst [vmem:[#allocation1] ss:$4 sm:$0xff] %v1646_v27  ;;  %v2237_v43 = vld [vmem:[%s3103_s1 + $0x14] sm:$0xf] }
 0x174   : > { %v1653_v0 = vld.sshfl [vmem:[#allocation1 + $0x10] sm:$0xff pattern:$0x73625140]  ;;  %v1651_v13 = vld.sshfl [vmem:[#allocation1 + $0x8] sm:$0xff pattern:$0x73625140] }
 0x175   : > { %1659 = vrot.lane.b32.xlu0 %v1653_v0, %s2502_s29  ;;  %1657 = vrot.lane.b32.xlu2 %v1651_v13, %s2502_s29  ;;  %v1649_v15 = vld.sshfl [vmem:[#allocation1] sm:$0xff pattern:$0x73625140] }
 0x176   : > { %1655 = vrot.lane.b32.xlu1 %v1649_v15, %s2502_s29  ;;  %1720 = vst [vmem:[#allocation1] ss:$4 sm:$0xff] %v1718_v14 }
 0x17d   : > { %v1725_v16 = vld.sshfl [vmem:[#allocation1 + $0x10] sm:$0xff pattern:$0x73625140]  ;;  %v1723_v17 = vld.sshfl [vmem:[#allocation1 + $0x8] sm:$0xff pattern:$0x73625140] }
 0x17e   : > { %1731 = vrot.lane.b32.xlu0 %v1725_v16, %s2488_s6  ;;  %1729 = vrot.lane.b32.xlu2 %v1723_v17, %s2488_s6  ;;  %v1721_v20 = vld.sshfl [vmem:[#allocation1] sm:$0xff pattern:$0x73625140] }
 0x17f   : > { %1727 = vrot.lane.b32.xlu1 %v1721_v20, %s2488_s6  ;;  %1792 = vst [vmem:[#allocation1] ss:$4 sm:$0xff] %v1790_v18  ;;  %s2509_s6 = smov 20  }
 0x186   : > { %v1797_v21 = vld.sshfl [vmem:[#allocation1 + $0x10] sm:$0xff pattern:$0x73625140]  ;;  %v1795_v22 = vld.sshfl [vmem:[#allocation1 + $0x8] sm:$0xff pattern:$0x73625140] }
 0x187   : > { %1803 = vrot.lane.b32.xlu0 %v1797_v21, %s2503_s30  ;;  %1801 = vrot.lane.b32.xlu2 %v1795_v22, %s2503_s30  ;;  %v1793_v23 = vld.sshfl [vmem:[#allocation1] sm:$0xff pattern:$0x73625140] }
 0x188   : > { %1799 = vrot.lane.b32.xlu1 %v1793_v23, %s2503_s30  ;;  %s2147_s30 = scalar_lea.hbm %s3104_s2, %s2293_s27 }
 0x199   : > { %v1249_v25 = vpop.permute.xlu2 %1248 }
 0x1ab   : > { %v1370_v44 = vpop.permute.xlu2 %1369 }
 0x1b1   : > { %v1247_v26 = vpop.permute.xlu1 %1246 }
 0x1b2   : > { %v1251_v29 = vpop.permute.xlu0 %1250  ;;  %v1252_v30 = vsel %vm649_vm1, %v1247_v26, %v1249_v25 }
 0x1b3   : > { %v1265_v31 = vsel %vm194_vm0, %v1251_v29, 0  ;;  %v1259_v32 = vsel %vm194_vm0, %v1252_v30, 0  ;;  %v1253_v37 = vsel %vm649_vm1, %v1249_v25, %v1251_v29  ;;  %vm1373_vm1 = vcmask 1031168  }
 0x1b4   : > { %1300 = vmatpush.bf16.msra.mxu2 %v1265_v31  ;;  %1274 = vmatpush.bf16.msra.mxu0 %v1259_v32  ;;  %v1262_v41 = vsel %vm194_vm0, %v1253_v37, 0  ;;  %v1442_v19 = vpop.permute.xlu2 %1441 }
 0x1b5   : > { %1287 = vmatpush.bf16.msra.mxu1 %v1262_v41 }
 0x1b7   : > { %2241 = vmatmul.msk.bf16.vlgmr.msra.gmra.mxu0 %vm1254_vm15, %v2233_v46  ;;  %2243 = vmatmul.msk.bf16.vlgmr.msra.gmra.mxu2 %vm1254_vm15, %v2233_v46 }
 0x1b8   : > { %1339 = vmatpush.bf16.msrb.mxu0 %v1315_v35  ;;  %2242 = vmatmul.msk.bf16.vlgmr.msra.gmra.mxu1 %vm1254_vm15, %v2233_v46  ;;  %v2239_v35 = vld [vmem:[%s3103_s1 + $0x1c] sm:$0xf]  ;;  %v2240_v46 = vld [vmem:[%s3103_s1 + $0x20] sm:$0xf] }
 0x1b9   : > { %1352 = vmatpush.bf16.msrb.mxu1 %v1317_v49 }
 0x1bd   : > { %v1514_v55 = vpop.permute.xlu2 %1513 }
 0x1c3   : > { %v1372_v39 = vpop.permute.xlu0 %1371 }
 0x1c4   : > { %v1386_v45 = vsel %vm194_vm0, %v1372_v39, 0  ;;  %v1368_v47 = vpop.permute.xlu1 %1367  ;;  %v1375_v40 = vsel %vm1373_vm1, %v1370_v44, %v1372_v39 }
 0x1c5   : > { %1421 = vmatpush.bf16.msra.mxu0 %v1386_v45  ;;  %v1374_v50 = vsel %vm1373_vm1, %v1368_v47, %v1370_v44  ;;  %v1383_v48 = vsel %vm194_vm0, %v1375_v40, 0  ;;  %vm2041_vm1 = vcmask 392512  }
 0x1c6   : > { %v1380_v52 = vsel %vm194_vm0, %v1374_v50, 0  ;;  %1408 = vmatpush.bf16.msrb.mxu3 %v1383_v48  ;;  %v1588_v4 = vpop.permute.xlu2 %1587 }
 0x1c7   : > { %1395 = vmatpush.bf16.msrb.mxu2 %v1380_v52  ;;  %2245 = vmatmul.msk.bf16.vlgmr.msrb.gmra.mxu0 %vm1254_vm15, %v177_v24  ;;  %v1602_v34 = vsel %vm194_vm0, %v1588_v4, 0 }
 0x1c8   : > { %2246 = vmatmul.msk.bf16.vlgmr.msrb.gmra.mxu1 %vm1254_vm15, %v177_v24  ;;  %v2238_v24 = vld [vmem:[%s3103_s1 + $0x18] sm:$0xf] }
 0x1c9   : > { %2248 = vmatmul.msk.bf16.vlgmr.msrb.gmra.mxu3 %vm1254_vm15, %v2234_v53 }
 0x1ca   : > { %2247 = vmatmul.msk.bf16.vlgmr.msrb.gmra.mxu2 %vm1254_vm15, %v2234_v53 }
 0x1cc   : > { %v1444_v54 = vpop.permute.xlu0 %1443 }
 0x1cd   : > { %v1447_v57 = vsel %vm1445_vm2, %v1442_v19, %v1444_v54  ;;  %v1458_v58 = vsel %vm194_vm0, %v1444_v54, 0  ;;  %v1440_v51 = vpop.permute.xlu1 %1439 }
 0x1ce   : > { %v1455_v59 = vsel %vm194_vm0, %v1447_v57, 0  ;;  %v1446_v60 = vsel %vm1445_vm2, %v1440_v51, %v1442_v19  ;;  %1493 = vmatpush.bf16.msra.mxu3 %v1458_v58  ;;  %vm2071_vm2 = vcmask 458112  }
 0x1cf   : > { %v1452_v61 = vsel %vm194_vm0, %v1446_v60, 0  ;;  %1480 = vmatpush.bf16.msra.mxu2 %v1455_v59  ;;  %v1658_v10 = vpop.permute.xlu2 %1657 }
 0x1d0   : > { %1467 = vmatpush.bf16.msra.mxu1 %v1452_v61  ;;  %v1328_v49 = vpop.f32.mrf.mxu3 }
 0x1d5   : > { %v1516_v62 = vpop.permute.xlu0 %1515 }
 0x1d6   : > { %v1519_v63 = vsel %vm1517_vm3, %v1514_v55, %v1516_v62  ;;  %v1530_v1 = vsel %vm194_vm0, %v1516_v62, 0  ;;  %v1512_v2 = vpop.permute.xlu1 %1511 }
 0x1d7   : > { %v1527_v56 = vsel %vm194_vm0, %v1519_v63, 0  ;;  %v1518_v5 = vsel %vm1517_vm3, %v1512_v2, %v1514_v55  ;;  %1565 = vmatpush.bf16.msrb.mxu2 %v1530_v1  ;;  %2249 = vmatmul.msk.bf16.vlgmr.msra.gmra.mxu0 %vm1254_vm15, %v2234_v53  ;;  %vm2105_vm3 = vcmask 523712  }
 0x1d8   : > { %v1524_v7 = vsel %vm194_vm0, %v1518_v5, 0  ;;  %1552 = vmatpush.bf16.msrb.mxu1 %v1527_v56  ;;  %v1730_v15 = vpop.permute.xlu2 %1729  ;;  %v1330_v44 = vpop.f32.mrf.mxu3 }
 0x1d9   : > { %1539 = vmatpush.bf16.msrb.mxu0 %v1524_v7  ;;  %2250 = vmatmul.msk.bf16.vlgmr.msra.gmra.mxu1 %vm1254_vm15, %v2235_v3 }
 0x1da   : > { %2251 = vmatmul.msk.bf16.vlgmr.msra.gmra.mxu2 %vm1254_vm15, %v2235_v3  ;;  %2252 = vmatmul.msk.bf16.vlgmr.msra.gmra.mxu3 %vm1254_vm15, %v2235_v3 }
 0x1dc   : > { %1637 = vmatpush.bf16.msra.mxu1 %v1602_v34 }
 0x1de   : > { %v1586_v6 = vpop.permute.xlu1 %1585 }
 0x1df   : > { %v1591_v28 = vsel %vm1589_vm4, %v1586_v6, %v1588_v4  ;;  %v1584_v33 = vpop.permute.xlu0 %1583 }
 0x1e0   : > { %v1599_v8 = vsel %vm194_vm0, %v1591_v28, 0  ;;  %v1590_v9 = vsel %vm1589_vm4, %v1584_v33, %v1586_v6  ;;  %vm2108_vm4 = vcmask 523264  }
 0x1e1   : > { %v1596_v38 = vsel %vm194_vm0, %v1590_v9, 0  ;;  %1624 = vmatpush.bf16.msra.mxu0 %v1599_v8  ;;  %v1802_v25 = vpop.permute.xlu2 %1801 }
 0x1e2   : > { %1611 = vmatpush.bf16.msrb.mxu3 %v1596_v38 }
 0x1e7   : > { %v1660_v42 = vpop.permute.xlu0 %1659  ;;  %2253 = vmatmul.msk.bf16.vlgmr.msrb.gmra.mxu0 %vm1254_vm15, %v2236_v36 }
 0x1e8   : > { %v1663_v11 = vsel %vm1661_vm5, %v1658_v10, %v1660_v42  ;;  %v1674_v12 = vsel %vm194_vm0, %v1660_v42, 0  ;;  %v1656_v27 = vpop.permute.xlu1 %1655 }
 0x1e9   : > { %v1671_v0 = vsel %vm194_vm0, %v1663_v11, 0  ;;  %v1662_v13 = vsel %vm1661_vm5, %v1656_v27, %v1658_v10  ;;  %2254 = vmatmul.msk.bf16.vlgmr.msrb.gmra.mxu1 %vm1254_vm15, %v2236_v36  ;;  %1709 = vmatpush.bf16.msrb.mxu0 %v1674_v12  ;;  %v165_v10 = vlaneseq }
 0x1ea   : > { %v1668_v14 = vsel %vm194_vm0, %v1662_v13, 0  ;;  %1696 = vmatpush.bf16.msra.mxu3 %v1671_v0  ;;  %2255 = vmatmul.msk.bf16.vlgmr.msrb.gmra.mxu2 %vm1254_vm15, %v2236_v36 }
 0x1eb   : > { %1683 = vmatpush.bf16.msra.mxu2 %v1668_v14  ;;  %2256 = vmatmul.msk.bf16.vlgmr.msrb.gmra.mxu3 %vm1254_vm15, %v2237_v43  ;;  %v166_v12 = vshrl.u32 %v165_v10, 7  ;;  %v169_v27 = vand.u32 127, %v165_v10  ;;  %v2504_v14 = vmov 0.0  }
 0x1ed   : > { %v170_v0 = vmul.u32 2, %v169_v27 }
 0x1ef   : > { %vm3005_vm9 = vcmp.eq.s32.totalorder %v166_v12, %v170_v0 }
 0x1f0   : > { %v1732_v16 = vpop.permute.xlu0 %1731 }
 0x1f1   : > { %v1735_v17 = vsel %vm1733_vm6, %v1730_v15, %v1732_v16  ;;  %v1746_v18 = vsel %vm194_vm0, %v1732_v16, 0  ;;  %v1728_v20 = vpop.permute.xlu1 %1727 }
 0x1f2   : > { %v1743_v21 = vsel %vm194_vm0, %v1735_v17, 0  ;;  %v1734_v22 = vsel %vm1733_vm6, %v1728_v20, %v1730_v15  ;;  %1781 = vmatpush.bf16.msrb.mxu3 %v1746_v18 }
 0x1f3   : > { %v1740_v23 = vsel %vm194_vm0, %v1734_v22, 0  ;;  %1768 = vmatpush.bf16.msrb.mxu2 %v1743_v21  ;;  %v2505_v21 = vmov 1.0  }
 0x1f4   : > { %1755 = vmatpush.bf16.msrb.mxu1 %v1740_v23 }
 0x1f7   : > { %2257 = vmatmul.msk.bf16.vlgmr.msra.gmra.mxu0 %vm1254_vm15, %v2237_v43 }
 0x1f9   : > { %v1804_v26 = vpop.permute.xlu0 %1803  ;;  %2258 = vmatmul.msk.bf16.vlgmr.msra.gmra.mxu1 %vm1254_vm15, %v2237_v43  ;;  %v167_v43 = vadd.s32 8, %v166_v12 }
 0x1fa   : > { %v1807_v29 = vsel %vm1805_vm7, %v1802_v25, %v1804_v26  ;;  %v1818_v30 = vsel %vm194_vm0, %v1804_v26, 0  ;;  %v1800_v31 = vpop.permute.xlu1 %1799  ;;  %2259 = vmatmul.msk.bf16.vlgmr.msra.gmra.mxu2 %vm1254_vm15, %v2238_v24 }
 0x1fb   : > { %v1815_v32 = vsel %vm194_vm0, %v1807_v29, 0  ;;  %v1806_v37 = vsel %vm1805_vm7, %v1800_v31, %v1802_v25  ;;  %2260 = vmatmul.msk.bf16.vlgmr.msra.gmra.mxu3 %vm1254_vm15, %v2238_v24  ;;  %1853 = vmatpush.bf16.msra.mxu2 %v1818_v30  ;;  %vm172_vm8 = vcmp.eq.s32.totalorder %v167_v43, %v170_v0 }
 0x1fc   : > { %v1812_v41 = vsel %vm194_vm0, %v1806_v37, 0  ;;  %1840 = vmatpush.bf16.msra.mxu1 %v1815_v32  ;;  %vm1866_vm0 = vcmask 1046528   ;;  %v2232_v15 = vsel %vm172_vm8, 1.0, %v2504_v14 }
 0x1fd   : > { %1827 = vmatpush.bf16.msra.mxu0 %v1812_v41  ;;  %2268 = vmatpush.msk.msra.mxu3 %vm1866_vm0, %v2232_v15 }
 0x1ff   : > { %2269 = vmatpush.msk.msra.mxu3 %vm3005_vm9, %v2505_v21 }
 0x207   : > { %2261 = vmatmul.msk.bf16.vlgmr.msrb.gmra.mxu0 %vm1254_vm15, %v2238_v24 }
 0x208   : > { %2274 = vmatpush.msk.msrb.mxu0 %vm1866_vm0, %v2232_v15 }
 0x209   : > { %2262 = vmatmul.msk.bf16.vlgmr.msrb.gmra.mxu1 %vm1254_vm15, %v2239_v35 }
 0x20a   : > { %2263 = vmatmul.msk.bf16.vlgmr.msrb.gmra.mxu2 %vm1254_vm15, %v2239_v35  ;;  %2277 = vmatpush.msk.msrb.mxu1 %vm1866_vm0, %v2232_v15 }
 0x20b   : > { %2264 = vmatmul.msk.bf16.vlgmr.msrb.gmra.mxu3 %vm1254_vm15, %v2239_v35  ;;  %2280 = vmatpush.msk.msrb.mxu2 %vm1866_vm0, %v2232_v15 }
 0x20c   : > { %2275 = vmatpush.msk.msrb.mxu0 %vm3005_vm9, %v2505_v21  ;;  %2271 = vmatpush.msk.msrb.mxu3 %vm1866_vm0, %v2232_v15 }
 0x20d   : > { %2281 = vmatpush.msk.msrb.mxu2 %vm3005_vm9, %v2505_v21  ;;  %2278 = vmatpush.msk.msrb.mxu1 %vm3005_vm9, %v2505_v21 }
 0x20e   : > { %2272 = vmatpush.msk.msrb.mxu3 %vm3005_vm9, %v2505_v21 }
 0x217   : > { %2265 = vmatmul.msk.bf16.vlgmr.msra.gmra.mxu0 %vm1254_vm15, %v2240_v46 }
 0x218   : > { %2286 = vmatpush.msk.msra.mxu0 %vm1866_vm0, %v2232_v15 }
 0x219   : > { %2266 = vmatmul.msk.bf16.vlgmr.msra.gmra.mxu1 %vm1254_vm15, %v2240_v46 }
 0x21a   : > { %2267 = vmatmul.msk.bf16.vlgmr.msra.gmra.mxu2 %vm1254_vm15, %v2240_v46  ;;  %2289 = vmatpush.msk.msra.mxu1 %vm1866_vm0, %v2232_v15 }
 0x21b   : > { %2287 = vmatpush.msk.msra.mxu0 %vm3005_vm9, %v2505_v21 }
 0x21c   : > { %2290 = vmatpush.msk.msra.mxu1 %vm3005_vm9, %v2505_v21 }
 0x234   : > { %v1276_v19 = vpop.f32.mrf.mxu0 }
 0x235   : > { %v1289_v39 = vpop.f32.mrf.mxu1  ;;  %v2995_v45 = vadd.f32 %v1328_v49, %v1276_v19 }
 0x23a   : > { %v1302_v47 = vpop.f32.mrf.mxu2 }
 0x23c   : > { %v1278_v40 = vpop.f32.mrf.mxu0 }
 0x23d   : > { %v1291_v50 = vpop.f32.mrf.mxu1 }
 0x242   : > { %v1304_v48 = vpop.f32.mrf.mxu2 }
 0x244   : > { %v1341_v52 = vpop.f32.mrf.mxu0 }
 0x245   : > { %v1342_v53 = vadd.f32 %v1341_v52, %v1289_v39  ;;  %v1354_v54 = vpop.f32.mrf.mxu1 }
 0x246   : > { %v1355_v55 = vadd.f32 %v1354_v54, %v1302_v47 }
 0x24c   : > { %v1410_v57 = vpop.f32.mrf.mxu3  ;;  %v1343_v58 = vpop.f32.mrf.mxu0 }
 0x24d   : > { %v1397_v51 = vpop.f32.mrf.mxu2  ;;  %v1356_v59 = vpop.f32.mrf.mxu1  ;;  %v1428_v29 = vadd.f32 %v1410_v57, %v1342_v53 }
 0x24e   : > { %v1427_v26 = vadd.f32 %v1397_v51, %v2995_v45 }
 0x254   : > { %v1412_v60 = vpop.f32.mrf.mxu3  ;;  %v1423_v61 = vpop.f32.mrf.mxu0 }
 0x255   : > { %v1399_v62 = vpop.f32.mrf.mxu2  ;;  %v2997_v63 = vadd.f32 %v1423_v61, %v1355_v55 }
 0x256   : > { %v1469_v1 = vpop.f32.mrf.mxu1 }
 0x257   : > { %v1499_v30 = vadd.f32 %v1469_v1, %v1427_v26 }
 0x25c   : > { %v1425_v2 = vpop.f32.mrf.mxu0 }
 0x25d   : > { %v1482_v3 = vpop.f32.mrf.mxu2  ;;  %v2999_v4 = vpop.f32.mrf.mxu3 }
 0x25e   : > { %v1471_v56 = vpop.f32.mrf.mxu1  ;;  %v1500_v32 = vadd.f32 %v1482_v3, %v1428_v29  ;;  %v1501_v57 = vadd.f32 %v2999_v4, %v2997_v63 }
 0x264   : > { %v1541_v5 = vpop.f32.mrf.mxu0 }
 0x265   : > { %v1484_v7 = vpop.f32.mrf.mxu2  ;;  %v1497_v34 = vpop.f32.mrf.mxu3  ;;  %v1571_v37 = vadd.f32 %v1541_v5, %v1499_v30 }
 0x266   : > { %v1554_v6 = vpop.f32.mrf.mxu1 }
 0x267   : > { %v1572_v49 = vadd.f32 %v1554_v6, %v1500_v32 }
 0x26c   : > { %v1543_v28 = vpop.f32.mrf.mxu0 }
 0x26d   : > { %v3001_v33 = vpop.f32.mrf.mxu2 }
 0x26e   : > { %v1613_v8 = vpop.f32.mrf.mxu3  ;;  %v1556_v9 = vpop.f32.mrf.mxu1  ;;  %v1573_v51 = vadd.f32 %v3001_v33, %v1501_v57 }
 0x26f   : > { %v1643_v44 = vadd.f32 %v1613_v8, %v1571_v37 }
 0x274   : > { %v1626_v38 = vpop.f32.mrf.mxu0 }
 0x275   : > { %v1569_v36 = vpop.f32.mrf.mxu2  ;;  %v1644_v19 = vadd.f32 %v1626_v38, %v1572_v49 }
 0x276   : > { %v1615_v42 = vpop.f32.mrf.mxu3  ;;  %v3003_v11 = vpop.f32.mrf.mxu1 }
 0x277   : > { %v1645_v61 = vadd.f32 %v3003_v11, %v1573_v51 }
 0x27c   : > { %v1628_v13 = vpop.f32.mrf.mxu0 }
 0x27d   : > { %v1685_v17 = vpop.f32.mrf.mxu2 }
 0x27e   : > { %v1698_v18 = vpop.f32.mrf.mxu3  ;;  %v1641_v20 = vpop.f32.mrf.mxu1  ;;  %v1715_v39 = vadd.f32 %v1685_v17, %v1643_v44 }
 0x27f   : > { %v1716_v47 = vadd.f32 %v1698_v18, %v1644_v19 }
 0x284   : > { %v1711_v22 = vpop.f32.mrf.mxu0 }
 0x285   : > { %v1687_v23 = vpop.f32.mrf.mxu2  ;;  %v1717_v62 = vadd.f32 %v1711_v22, %v1645_v61 }
 0x286   : > { %v1700_v24 = vpop.f32.mrf.mxu3  ;;  %v1757_v25 = vpop.f32.mrf.mxu1 }
 0x287   : > { %v1787_v40 = vadd.f32 %v1757_v25, %v1715_v39 }
 0x28c   : > { %v1713_v31 = vpop.f32.mrf.mxu0 }
 0x28d   : > { %v1770_v41 = vpop.f32.mrf.mxu2 }
 0x28e   : > { %v1783_v35 = vpop.f32.mrf.mxu3  ;;  %v1759_v46 = vpop.f32.mrf.mxu1  ;;  %v1788_v48 = vadd.f32 %v1770_v41, %v1716_v47 }
 0x28f   : > { %v1789_v1 = vadd.f32 %v1783_v35, %v1717_v62 }
 0x294   : > { %v1829_v50 = vpop.f32.mrf.mxu0 }
 0x295   : > { %v1772_v52 = vpop.f32.mrf.mxu2  ;;  %v1859_v54 = vadd.f32 %v1829_v50, %v1787_v40 }
 0x296   : > { %v1842_v45 = vpop.f32.mrf.mxu1  ;;  %v1785_v53 = vpop.f32.mrf.mxu3 }
 0x297   : > { %v1860_v55 = vadd.f32 %v1842_v45, %v1788_v48  ;;  %1922 = vrot.lane.b32.xlu2 %v1859_v54, %s2506_s4  ;;  %1892 = vrot.lane.b32.xlu1 %v1859_v54, %s2502_s29  ;;  %s2508_s29 = smov 76  }
 0x298   : > { %2270 = vmatmul.msk.f32.vlgmr.msra.gmra.mxu3 %vm1862_vm10, %v1859_v54 }
 0x299   : > { %1983 = vrot.lane.b32.xlu0 %v1860_v55, %s2507_s5  ;;  %2283 = vmatpush.msk.msra.mxu3 %vm1866_vm0, %v2232_v15 }
 0x29b   : > { %2284 = vmatpush.msk.msra.mxu3 %vm3005_vm9, %v2505_v21 }
 0x29c   : > { %v1831_v58 = vpop.f32.mrf.mxu0 }
 0x29d   : > { %v1855_v59 = vpop.f32.mrf.mxu2 }
 0x29e   : > { %v1844_v60 = vpop.f32.mrf.mxu1  ;;  %v1861_v63 = vadd.f32 %v1855_v59, %v1789_v1 }
 0x29f   : > { %2013 = vrot.lane.b32.xlu2 %v1860_v55, %s2508_s29  ;;  %1952 = vrot.lane.b32.xlu1 %v1859_v54, %s2509_s6 }
 0x2a1   : > { %2043 = vrot.lane.b32.xlu0 %v1860_v55, %s2510_s7 }
 0x2a5   : > { %v1857_v2 = vpop.f32.mrf.mxu2 }
 0x2a7   : > { %2076 = vrot.lane.b32.xlu2 %v1861_v63, %s2511_s8  ;;  %2074 = vrot.lane.b32.xlu1 %v1860_v55, %s2511_s8  ;;  %s2432_s8 = scalar_lea.hbm %s3104_s2, 16 }
 0x2f1   : > { %v1923_v3 = vpop.permute.xlu2 %1922 }
 0x2f2   : > { %2276 = vmatmul.msk.f32.vlgmr.msrb.gmra.mxu0 %vm1862_vm10, %v1923_v3 }
 0x2f9   : > { %v2014_v5 = vpop.permute.xlu2 %2013 }
 0x301   : > { %v2077_v6 = vpop.permute.xlu2 %2076 }
 0x309   : > { %v1893_v4 = vpop.permute.xlu1 %1892 }
 0x30a   : > { %2273 = vmatmul.msk.f32.vlgmr.msrb.gmra.mxu3 %vm1862_vm10, %v1893_v4 }
 0x30b   : > { %v1984_v56 = vpop.permute.xlu0 %1983 }
 0x30c   : > { %2282 = vmatmul.msk.f32.vlgmr.msrb.gmra.mxu2 %vm1862_vm10, %v1984_v56 }
 0x311   : > { %v1953_v7 = vpop.permute.xlu1 %1952 }
 0x312   : > { %2279 = vmatmul.msk.f32.vlgmr.msrb.gmra.mxu1 %vm1862_vm10, %v1953_v7  ;;  %2285 = vmatmul.msk.f32.vlgmr.msra.gmra.mxu3 %vm1862_vm10, %v2014_v5 }
 0x313   : > { %v2044_v34 = vpop.permute.xlu0 %2043 }
 0x314   : > { %2288 = vmatmul.msk.f32.vlgmr.msra.gmra.mxu0 %vm1862_vm10, %v2044_v34 }
 0x319   : > { %v2075_v28 = vpop.permute.xlu1 %2074 }
 0x31a   : > { %v2078_v33 = vsel %vm1254_vm15, %v2075_v28, %v2077_v6  ;;  %vm2011_vm15 = vcmask 326912  }
 0x31b   : > { %v1887_v8 = vpop.f32.mrf.mxu3  ;;  %2291 = vmatmul.msk.f32.vlgmr.msra.gmra.mxu1 %vm1862_vm10, %v2078_v33 }
 0x31c   : > { %1891 = vst.msk [vmem:[%s3051_s16] sm:$0xff] %vm1890_vm11, %v1887_v8 }
 0x36f   : > { %v1943_v9 = vpop.f32.mrf.mxu0 }
 0x370   : > { %1947 = vrot.lane.b32.xlu1 %v1943_v9, %s2512_s17 }
 0x38d   : > { %v1913_v38 = vpop.f32.mrf.mxu3 }
 0x38e   : > { %1917 = vrot.lane.b32.xlu0 %v1913_v38, %s2513_s19 }
 0x38f   : > { %v1973_v36 = vpop.f32.mrf.mxu1  ;;  %v2004_v10 = vpop.f32.mrf.mxu2 }
 0x390   : > { %1977 = vrot.lane.b32.xlu2 %v1973_v36, %s2514_s23 }
 0x391   : > { %v2064_v11 = vpop.f32.mrf.mxu0 }
 0x395   : > { %v2034_v42 = vpop.f32.mrf.mxu3 }
 0x396   : > { %2008 = vrot.lane.b32.xlu0 %v2004_v10, %s2515_s24  ;;  %2038 = vrot.lane.b32.xlu1 %v2034_v42, %s2510_s7 }
 0x398   : > { %2068 = vrot.lane.b32.xlu2 %v2064_v11, %s2516_s26  ;;  %v2098_v12 = vpop.f32.mrf.mxu1 }
 0x39e   : > { %2102 = vrot.lane.b32.xlu0 %v2098_v12, %s2506_s4  ;;  %s2151_s4 = sshll.u32 %s2147_s30, 4  ;;  %s2152_s4 = int_to_ptr.hbm [resolvable:$true] %s2151_s4 }
 0x39f   : > { %s2426_s5 = sshra.s32 %s2152_s4, 4  ;;  %s2427_s5 = int_to_ptr.hbm [resolvable:$true] %s2426_s5 }
 0x3a0   : > { %s2428_s29 = scalar_lea.hbm %s2427_s5, 8  ;;  %p2433_p0 = scmp.lt.s32.totalorder %s2427_s5, %s3104_s2 }
 0x3a1   : > { %p2429_p6 = scmp.ne.s32.totalorder %s2427_s5, %s2428_s29  ;;  %p2434_p1 = scmp.lt.s32.totalorder %s2432_s8, %s2428_s29 }
 0x3a3   : > { %p2430_p9 = pnand %p2429_p6, %p2582_p11  ;;  %p2435_p3 = por %p2434_p1, %p2433_p0 }
 0x3a5   : > { %p2431_p13 = pneg %p2430_p9 }
 0x3a7   : > { %p2436_p4 = pnand %p2435_p3, %p2431_p13 }
 0x3e2   : > { %v1948_v27 = vpop.permute.xlu1 %1947 }
 0x3ea   : > { %v1978_v43 = vpop.permute.xlu2 %1977 }
 0x3f2   : > { %v2069_v15 = vpop.permute.xlu2 %2068 }
 0x400   : > { %v1918_v0 = vpop.permute.xlu0 %1917 }
 0x401   : > { %1921 = vst.msk [vmem:[%s3051_s16] sm:$0xff] %vm1920_vm12, %v1918_v0 }
 0x402   : > { %1951 = vst.msk [vmem:[%s3051_s16] sm:$0xff] %vm1950_vm13, %v1948_v27 }
 0x403   : > { %1981 = vst.msk [vmem:[%s3051_s16] sm:$0xff] %vm1980_vm14, %v1978_v43 }
 0x408   : > { %v2009_v13 = vpop.permute.xlu0 %2008  ;;  %v2039_v14 = vpop.permute.xlu1 %2038 }
 0x409   : > { %2012 = vst.msk [vmem:[%s3051_s16] sm:$0xff] %vm2011_vm15, %v2009_v13 }
 0x40a   : > { %2042 = vst.msk [vmem:[%s3051_s16] sm:$0xff] %vm2041_vm1, %v2039_v14 }
 0x40b   : > { %2072 = vst.msk [vmem:[%s3051_s16] sm:$0xff] %vm2071_vm2, %v2069_v15 }
 0x410   : > { %v2103_v16 = vpop.permute.xlu0 %2102 }
 0x411   : > { %2106 = vst.msk [vmem:[%s3051_s16] sm:$0xff] %vm2105_vm3, %v2103_v16 }
 0x418   : > { %v2107_v17 = vld [vmem:[%s3051_s16] sm:$0xff] }
 0x419   : > { %v2109_v18 = vsel %vm2108_vm4, %v2107_v17, 0.0  ;;  %v2113_v20 = vmul.f32 %v2107_v17, %v2107_v17 }
 0x41a   : > { %2110 = vadd.xlane.f32.xlu1 %v2109_v18 }
 0x41b   : > { %v2114_v21 = vsel %vm2108_vm4, %v2113_v20, 0.0 }
 0x41c   : > { %2115 = vadd.xlane.f32.xlu2 %v2114_v21 }
 0x48d   : > { %v2111_v22 = vpop.xlane.xlu1 %2110 }
 0x48e   : > { %v2112_v23 = vmul.f32 0.015625, %v2111_v22 }
 0x48f   : > { %v2116_v24 = vpop.xlane.xlu2 %2115 }
 0x490   : > { %v2118_v25 = vmul.f32 %v2112_v23, %v2112_v23  ;;  %v2117_v26 = vmul.f32 0.015625, %v2116_v24  ;;  %v2121_v44 = vsub.f32 %v2107_v17, %v2112_v23 }
 0x492   : > { %v2119_v29 = vsub.f32 %v2117_v26, %v2118_v25 }
 0x494   : > { %v2120_v30 = vmax.f32 %v2119_v29, 0.0 }
 0x496   : > { %v2122_v31 = vadd.f32 1e-05, %v2120_v30 }
 0x498   : > { %2380 = vrsqrt.f32 %v2122_v31  ;;  %vm2129_vm6 = vweird.f32 %v2122_v31 }
 0x49e   : > { %v2381_v32 = vpop.eup %2380 }
 0x49f   : > { %v2124_v37 = vmul.f32 %v2381_v32, %v2122_v31  ;;  %vm2130_vm5 = vweird.f32 %v2381_v32 }
 0x4a0   : > { %vm2131_vm7 = vmor %vm2129_vm6, %vm2130_vm5 }
 0x4a1   : > { %v2125_v41 = vmul.f32 %v2381_v32, %v2124_v37 }
 0x4a3   : > { %v2126_v35 = vmul.f32 0.5, %v2125_v41 }
 0x4a5   : > { %v2127_v46 = vsub.f32 1.5, %v2126_v35 }
 0x4a7   : > { %v2128_v49 = vmul.f32 %v2381_v32, %v2127_v46 }
 0x4a9   : > { %v2132_v19 = vsel %vm2131_vm7, %v2381_v32, %v2128_v49 }
 0x4aa   : > { %v2133_v39 = vmul.f32 %v2132_v19, %v2121_v44 }
 0x4ac   : > { %v2134_v47 = vmax.f32 %v2133_v39, 0.0 }
 0x4ae   : > { %2135 = vst.msk [vmem:[%s3051_s16] sm:$0xff] %vm2108_vm4, %v2134_v47 }
 0x4af   : > { %2439 = shalt.err (!%p2436_p4)
}
 0x4b0   : > { %2299 = dma.vmem_to_hbm [thread:$0]  (%p2582_p11), %s2150_s3, 128, %s2152_s4, %s2137_s13  }
 0x4b1 PF: > { %s2163_s25 = sand.u32 1, %s2466_s9   ;;  %p3116_p7 = scmp.ge.s32.totalorder %s2478_s12, 2 }
 0x4b2   : > { %s2164_s16 = scalar_lea.sflag [#allocation5], %s2163_s25 }
 0x4b3   : > { %p2306_p5 = pnand %p3116_p7, %p2586_p12 }
 0x4b5   : > { %p2307_p8 = pneg %p2306_p5 }
 0x4b7   : > { %2461 = dma.done.wait (%p2307_p8), %s2164_s16, 128  }
 0x4b8   : > { %2463 = vsyncadd (%p2307_p8), %s2164_s16, 4294967168  ;;  %p15_p10 = scmp.ge.s32.totalorder %s2557_s15, 4   ;;  %s3117_s9 = smov %s2470_s10 }
 0x4b9   : > { %s3118_s10 = smov %s2474_s11  ;;  %s3119_s11 = smov %s2569_s18 }
 0x4ba   : > { %s3120_s12 = smov %s2557_s15  ;;  %17 = sbr.rel (!%p15_p10) target bundleno = 5 (0x5), region = 129 }
 0x4bf   :  { %2170 = vsyncpa [#allocation4], 1 }
 0x4c0   :  { %2172 = vsyncpa [#allocation4 + $0x1], 1 }
 0x4c1   :  { %2173 = vsyncpa [#allocation5], 1 }
 0x4c2   :  { %2175 = vsyncpa [#allocation5 + $0x1], 1 }

</bundles_post_ra>
